<compile_context>
chip_gen: v5e
topology: v5e:2x2
jax: 0.10.0
libtpu: 0.0.40
codegen_flags: <defaults>
</compile_context>

<pallas_src>
import functools
import numpy as np
import jax
import jax.numpy as jnp
from jax import lax
from jax.experimental import pallas as pl
from jax.experimental.pallas import tpu as pltpu


# ----------------------------- in-kernel helpers -----------------------------
def _erf(x):
    # Numerical Recipes erfc approximation, fractional error < 1.2e-7.
    a = jnp.abs(x)
    t = 1.0 / (1.0 + 0.5 * a)
    poly = -1.26551223 + t * (1.00002368 + t * (0.37409196 + t * (0.09678418 +
           t * (-0.18628806 + t * (0.27886807 + t * (-1.13520398 + t * (1.48851587 +
           t * (-0.82215223 + t * 0.17087277))))))))
    erfc_a = t * jnp.exp(-a * a + poly)
    return jnp.where(x >= 0, 1.0 - erfc_a, erfc_a - 1.0)


def _gelu_exact(x):
    return 0.5 * x * (1.0 + _erf(x * np.float32(1.0 / np.sqrt(2.0))))


# 3x3 taps, k = (dy+1)*3 + (dx+1)  (matches the im2col weight reshape below)
_TAPS = tuple((dy, dx) for dy in (-1, 0, 1) for dx in (-1, 0, 1))


# --------------------------------- kernel ------------------------------------
def ffc_kernel(x_ref, prew_ref, preb_ref, gcat_ref, mask_ref,
               w1_ref, b1_ref, w2_ref, b2_ref, bcat_ref,
               postw_ref, postb_ref, o_ref, *, Wf, PF):
    """Channels on sublanes, flattened spatial on lanes.

    x_ref (1,Cin,HW)  gcat_ref (HW,2*PF)  bcat_ref (2*PF,HW)  mask_ref (9,1,PF)
    w1/w2 (2C,9*2C)   biases (*,1)        o_ref (1,Cout,HW)
    """
    f32 = jnp.float32
    x = x_ref[0]                                                   # (Cin, HW)
    masks = mask_ref[...]                                          # (9, 1, PF)

    # --- pre: 1x1 conv (weights pre-squared in glue) ---
    y = jnp.dot(prew_ref[...], x, preferred_element_type=f32) + preb_ref[...]

    # --- rfft2 (ortho): one fused matmul against [Gr | Gi] (lane-padded) ---
    fcat = jnp.dot(y, gcat_ref[...], preferred_element_type=f32)   # (Cout, 2*PF)
    f = jnp.concatenate([fcat[:, :PF], fcat[:, PF:]], axis=0)      # (2C, PF)

    # --- 3x3 conv (pad=1) as im2col: 9 rolled+masked copies, ONE matmul ---
    def conv3x3(a, w_ref, b_ref):
        cols = []
        for k, (dy, dx) in enumerate(_TAPS):
            s = dy * Wf + dx                                       # flat-grid shift
            shifted = jnp.roll(a, -s, axis=1) if s != 0 else a     # out[p] = a[p+s]
            cols.append(shifted * masks[k])                        # zero at grid borders / pad tail
        patch = jnp.concatenate(cols, axis=0)                      # (9*2C, PF)
        return jnp.dot(w_ref[...], patch, preferred_element_type=f32) + b_ref[...]

    h1 = _gelu_exact(conv3x3(f, w1_ref, b1_ref))                   # (2C, PF)
    h2 = _gelu_exact(conv3x3(h1, w2_ref, b2_ref))                  # (2C, PF)

    # --- split real/imag (static sublane slices) + fused irfft2 (ortho) ---
    C = h2.shape[0] // 2
    hcat = jnp.concatenate([h2[:C, :], h2[C:, :]], axis=1)         # (C, 2*PF)
    z = jnp.dot(hcat, bcat_ref[...], preferred_element_type=f32)   # (C, HW)

    # --- post: 1x1 conv ---
    o_ref[0] = jnp.dot(postw_ref[...], z, preferred_element_type=f32) + postb_ref[...]


# ------------------------- cached spectral constants -------------------------
@functools.lru_cache(maxsize=8)
def _spectral_constants(H, W):
    """Forward/inverse ortho-DFT matrices (lane-padded) + per-tap boundary masks."""
    assert W % 2 == 0, "Hermitian fold-back weighting assumes even W"
    Wf = W // 2 + 1
    HW, HWf = H * W, H * Wf
    PF = max(128, ((HWf + 127) // 128) * 128)                      # lane-aligned spectral length

    scale = 1.0 / np.sqrt(H * W)
    hh = np.arange(H)[:, None, None, None]
    ww = np.arange(W)[None, :, None, None]
    kk = np.arange(H)[None, None, :, None]
    mm = np.arange(Wf)[None, None, None, :]
    phase = 2.0 * np.pi * (hh * kk / H + ww * mm / W)              # (H, W, H, Wf)
    gcat = np.zeros((HW, 2 * PF), np.float32)
    gcat[:, :HWf]        = (np.cos(phase) * scale).reshape(HW, HWf)
    gcat[:, PF:PF + HWf] = (-np.sin(phase) * scale).reshape(HW, HWf)

    mult = np.ones(Wf)
    mult[1:Wf - 1] = 2.0                                           # Hermitian weights (even W)
    kk2 = np.arange(H)[:, None, None, None]
    mm2 = np.arange(Wf)[None, :, None, None]
    hh2 = np.arange(H)[None, None, :, None]
    ww2 = np.arange(W)[None, None, None, :]
    phase2 = 2.0 * np.pi * (hh2 * kk2 / H + ww2 * mm2 / W)         # (H, Wf, H, W)
    bcat = np.zeros((2 * PF, HW), np.float32)
    bcat[:HWf]        = (mult[None, :, None, None] * np.cos(phase2) * scale).reshape(HWf, HW)
    bcat[PF:PF + HWf] = (-mult[None, :, None, None] * np.sin(phase2) * scale).reshape(HWf, HW)

    # boundary masks for the 9 taps on the padded flat (H, Wf) grid
    p = np.arange(PF)
    hp, mp = p // Wf, p % Wf
    valid = p < HWf
    masks = np.zeros((9, 1, PF), np.float32)
    for k, (dy, dx) in enumerate(_TAPS):
        ok = valid & (hp + dy >= 0) & (hp + dy < H) & (mp + dx >= 0) & (mp + dx < Wf)
        masks[k, 0] = ok.astype(np.float32)

    return jnp.asarray(gcat), jnp.asarray(bcat), jnp.asarray(masks), Wf, PF


# --------------------------------- wrapper ------------------------------------
def simple_ffc_block(x, params):
    """x: (N, Cin, H, W) float32 (NCHW, matching the torch module)."""
    N, Cin, H, W = x.shape
    Cout = params["pre_w"].shape[0]
    C2 = 2 * Cout
    HW = H * W
    gcat, bcat, masks, Wf, PF = _spectral_constants(H, W)
    f32 = jnp.float32

    # weight squaring + im2col weight layout hoisted out of the kernel
    prew2 = params["pre_w"][:, :, 0, 0].astype(f32) ** 2                       # (Cout, Cin)
    preb  = params["pre_b"].astype(f32).reshape(Cout, 1)
    w1m = jnp.transpose(params["ffn1_w"].astype(f32) ** 2, (2, 3, 1, 0)).reshape(9 * C2, C2).T
    b1  = params["ffn1_b"].astype(f32).reshape(C2, 1)
    w2m = jnp.transpose(params["ffn2_w"].astype(f32) ** 2, (2, 3, 1, 0)).reshape(9 * C2, C2).T
    b2  = params["ffn2_b"].astype(f32).reshape(C2, 1)
    postw2 = params["post_w"][:, :, 0, 0].astype(f32) ** 2                     # (Cout, Cout)
    postb  = params["post_b"].astype(f32).reshape(Cout, 1)

    x_p = x.reshape(N, Cin, HW).astype(f32)        # NCHW is already channel-major: no transpose

    def const_spec(shape):
        return pl.BlockSpec(shape, lambda n: (0,) * len(shape))

    out_p = pl.pallas_call(
        functools.partial(ffc_kernel, Wf=Wf, PF=PF),
        out_shape=jax.ShapeDtypeStruct((N, Cout, HW), f32),
        grid=(N,),
        in_specs=[
            pl.BlockSpec((1, Cin, HW), lambda n: (n, 0, 0)),
            const_spec((Cout, Cin)), const_spec((Cout, 1)),
            const_spec((HW, 2 * PF)), const_spec((9, 1, PF)),
            const_spec((C2, 9 * C2)), const_spec((C2, 1)),
            const_spec((C2, 9 * C2)), const_spec((C2, 1)),
            const_spec((2 * PF, HW)),
            const_spec((Cout, Cout)), const_spec((Cout, 1)),
        ],
        out_specs=pl.BlockSpec((1, Cout, HW), lambda n: (n, 0, 0)),
        compiler_params=pltpu.CompilerParams(
            dimension_semantics=("parallel",),          # lets v7x split the batch over its 2 TCs
            vmem_limit_bytes=32 * 1024 * 1024),
    )(x_p, prew2, preb, gcat, masks, w1m, b1, w2m, b2, bcat, postw2, postb)

    return out_p.reshape(N, Cout, H, W)


# ---------------------------- pure-JAX reference -----------------------------
def reference(x, params):
    def conv(v, w, b, pad):
        return lax.conv_general_dilated(
            v, w ** 2, window_strides=(1, 1),
            padding=((pad, pad), (pad, pad)),
            dimension_numbers=("NCHW", "OIHW", "NCHW")) + b[None, :, None, None]

    out = conv(x, params["pre_w"], params["pre_b"], 0)
    out = jnp.fft.rfft2(out.astype(jnp.float32), axes=(-2, -1), norm="ortho")
    out = jnp.concatenate([out.real, out.imag], axis=1)
    out = jax.nn.gelu(conv(out, params["ffn1_w"], params["ffn1_b"], 1), approximate=False)
    out = jax.nn.gelu(conv(out, params["ffn2_w"], params["ffn2_b"], 1), approximate=False)
    C = out.shape[1] // 2
    real, imag = out[:, :C], out[:, C:]
    out = jnp.fft.irfft2(real + 1j * imag, axes=(-2, -1), norm="ortho")
    out = conv(out.astype(jnp.float32), params["post_w"], params["post_b"], 0)
    return out


# ---------------------------------- main --------------------------------------
if __name__ == "__main__":
    N, in_ch, out_ch, H, W = 2, 4, 4, 16, 16
    key = jax.random.PRNGKey(0)
    ks = jax.random.split(key, 9)
    std = 0.3
    params = {
        "pre_w":  jax.random.normal(ks[0], (out_ch, in_ch, 1, 1), jnp.float32) * std,
        "pre_b":  jax.random.normal(ks[1], (out_ch,), jnp.float32) * std,
        "ffn1_w": jax.random.normal(ks[2], (2 * out_ch, 2 * out_ch, 3, 3), jnp.float32) * std,
        "ffn1_b": jax.random.normal(ks[3], (2 * out_ch,), jnp.float32) * std,
        "ffn2_w": jax.random.normal(ks[4], (2 * out_ch, 2 * out_ch, 3, 3), jnp.float32) * std,
        "ffn2_b": jax.random.normal(ks[5], (2 * out_ch,), jnp.float32) * std,
        "post_w": jax.random.normal(ks[6], (out_ch, out_ch, 1, 1), jnp.float32) * std,
        "post_b": jax.random.normal(ks[7], (out_ch,), jnp.float32) * std,
    }
    x = jax.random.normal(ks[8], (N, in_ch, H, W), jnp.float32)

    ffc = jax.jit(simple_ffc_block)
    out = jax.block_until_ready(ffc(x, params))
    ref = jax.block_until_ready(reference(x, params))
    np.testing.assert_allclose(np.asarray(out), np.asarray(ref), rtol=2e-3, atol=2e-3)
    print("KERNEL_OK")
</pallas_src>

<mosaic_0001>
module attributes {stable_mosaic.version = 11 : i64} {
  func.func @ffc_kernel(%arg0: i32, %arg1: memref<1x4x256xf32, #tpu.memory_space<vmem>>, %arg2: memref<4x4xf32, #tpu.memory_space<vmem>>, %arg3: memref<4x1xf32, #tpu.memory_space<vmem>>, %arg4: memref<256x512xf32, #tpu.memory_space<vmem>>, %arg5: memref<9x1x256xf32, #tpu.memory_space<vmem>>, %arg6: memref<8x72xf32, #tpu.memory_space<vmem>>, %arg7: memref<8x1xf32, #tpu.memory_space<vmem>>, %arg8: memref<8x72xf32, #tpu.memory_space<vmem>>, %arg9: memref<8x1xf32, #tpu.memory_space<vmem>>, %arg10: memref<512x256xf32, #tpu.memory_space<vmem>>, %arg11: memref<4x4xf32, #tpu.memory_space<vmem>>, %arg12: memref<4x1xf32, #tpu.memory_space<vmem>>, %arg13: memref<1x4x256xf32, #tpu.memory_space<vmem>>) attributes {dimension_semantics = [#tpu.dimension_semantics<parallel>], iteration_bounds = array<i64: 2>, scalar_prefetch = 0 : i64, scratch_operands = 0 : i64, tpu.core_type = #tpu.core_type<tc>, window_params = [{transform_indices = @transform_0, window_bounds = array<i64: 1, 4, 256>}, {pipeline_mode = #tpu.pipeline_mode<synchronous>, transform_indices = @transform_1, window_bounds = array<i64: 4, 4>}, {pipeline_mode = #tpu.pipeline_mode<synchronous>, transform_indices = @transform_2, window_bounds = array<i64: 4, 1>}, {pipeline_mode = #tpu.pipeline_mode<synchronous>, transform_indices = @transform_3, window_bounds = array<i64: 256, 512>}, {pipeline_mode = #tpu.pipeline_mode<synchronous>, transform_indices = @transform_4, window_bounds = array<i64: 9, 1, 256>}, {pipeline_mode = #tpu.pipeline_mode<synchronous>, transform_indices = @transform_5, window_bounds = array<i64: 8, 72>}, {pipeline_mode = #tpu.pipeline_mode<synchronous>, transform_indices = @transform_6, window_bounds = array<i64: 8, 1>}, {pipeline_mode = #tpu.pipeline_mode<synchronous>, transform_indices = @transform_7, window_bounds = array<i64: 8, 72>}, {pipeline_mode = #tpu.pipeline_mode<synchronous>, transform_indices = @transform_8, window_bounds = array<i64: 8, 1>}, {pipeline_mode = #tpu.pipeline_mode<synchronous>, transform_indices = @transform_9, window_bounds = array<i64: 512, 256>}, {pipeline_mode = #tpu.pipeline_mode<synchronous>, transform_indices = @transform_10, window_bounds = array<i64: 4, 4>}, {pipeline_mode = #tpu.pipeline_mode<synchronous>, transform_indices = @transform_11, window_bounds = array<i64: 4, 1>}, {transform_indices = @transform_12, window_bounds = array<i64: 1, 4, 256>}]} {
    %c0 = arith.constant 0 : index
    %c0_0 = arith.constant 0 : index
    %c0_1 = arith.constant 0 : index
    %0 = vector.load %arg1[%c0, %c0_0, %c0_1] : memref<1x4x256xf32, #tpu.memory_space<vmem>>, vector<1x4x256xf32>
    %1 = vector.shape_cast %0 : vector<1x4x256xf32> to vector<4x256xf32>
    %c0_2 = arith.constant 0 : index
    %c0_3 = arith.constant 0 : index
    %c0_4 = arith.constant 0 : index
    %2 = vector.load %arg5[%c0_2, %c0_3, %c0_4] : memref<9x1x256xf32, #tpu.memory_space<vmem>>, vector<9x1x256xf32>
    %c0_5 = arith.constant 0 : index
    %c0_6 = arith.constant 0 : index
    %3 = vector.load %arg2[%c0_5, %c0_6] : memref<4x4xf32, #tpu.memory_space<vmem>>, vector<4x4xf32>
    %cst = arith.constant dense<0.000000e+00> : vector<4x256xf32>
    %4 = tpu.matmul %3, %1, %cst {dimension_numbers = #tpu.dot_dimension_numbers<[1], [0], [0], [1], [0, 0, 1, 1], [], []>} : vector<4x4xf32>, vector<4x256xf32>, vector<4x256xf32> -> vector<4x256xf32>
    %c0_7 = arith.constant 0 : index
    %c0_8 = arith.constant 0 : index
    %5 = vector.load %arg3[%c0_7, %c0_8] : memref<4x1xf32, #tpu.memory_space<vmem>>, vector<4x1xf32>
    %6 = vector.broadcast %5 : vector<4x1xf32> to vector<4x256xf32>
    %7 = arith.addf %4, %6 : vector<4x256xf32>
    %c0_9 = arith.constant 0 : index
    %c0_10 = arith.constant 0 : index
    %8 = vector.load %arg4[%c0_9, %c0_10] : memref<256x512xf32, #tpu.memory_space<vmem>>, vector<256x512xf32>
    %cst_11 = arith.constant dense<0.000000e+00> : vector<4x512xf32>
    %9 = tpu.matmul %7, %8, %cst_11 {dimension_numbers = #tpu.dot_dimension_numbers<[1], [0], [0], [1], [0, 0, 1, 1], [], []>} : vector<4x256xf32>, vector<256x512xf32>, vector<4x512xf32> -> vector<4x512xf32>
    %10 = vector.extract_strided_slice %9 {offsets = [0, 0], sizes = [4, 256], strides = [1, 1]} : vector<4x512xf32> to vector<4x256xf32>
    %11 = vector.extract_strided_slice %9 {offsets = [0, 256], sizes = [4, 256], strides = [1, 1]} : vector<4x512xf32> to vector<4x256xf32>
    %12 = tpu.concatenate %10, %11 in 0 : vector<4x256xf32>, vector<4x256xf32> -> vector<8x256xf32>
    %13 = vector.extract_strided_slice %12 {offsets = [0, 246], sizes = [8, 10], strides = [1, 1]} : vector<8x256xf32> to vector<8x10xf32>
    %14 = vector.extract_strided_slice %12 {offsets = [0, 0], sizes = [8, 246], strides = [1, 1]} : vector<8x256xf32> to vector<8x246xf32>
    %15 = tpu.concatenate %13, %14 in 1 : vector<8x10xf32>, vector<8x246xf32> -> vector<8x256xf32>
    %16 = vector.extract_strided_slice %2 {offsets = [0, 0, 0], sizes = [1, 1, 256], strides = [1, 1, 1]} : vector<9x1x256xf32> to vector<1x1x256xf32>
    %17 = vector.shape_cast %16 : vector<1x1x256xf32> to vector<1x256xf32>
    %18 = vector.broadcast %17 : vector<1x256xf32> to vector<8x256xf32>
    %19 = arith.mulf %15, %18 : vector<8x256xf32>
    %20 = vector.extract_strided_slice %12 {offsets = [0, 247], sizes = [8, 9], strides = [1, 1]} : vector<8x256xf32> to vector<8x9xf32>
    %21 = vector.extract_strided_slice %12 {offsets = [0, 0], sizes = [8, 247], strides = [1, 1]} : vector<8x256xf32> to vector<8x247xf32>
    %22 = tpu.concatenate %20, %21 in 1 : vector<8x9xf32>, vector<8x247xf32> -> vector<8x256xf32>
    %23 = vector.extract_strided_slice %2 {offsets = [1, 0, 0], sizes = [1, 1, 256], strides = [1, 1, 1]} : vector<9x1x256xf32> to vector<1x1x256xf32>
    %24 = vector.shape_cast %23 : vector<1x1x256xf32> to vector<1x256xf32>
    %25 = vector.broadcast %24 : vector<1x256xf32> to vector<8x256xf32>
    %26 = arith.mulf %22, %25 : vector<8x256xf32>
    %27 = vector.extract_strided_slice %12 {offsets = [0, 248], sizes = [8, 8], strides = [1, 1]} : vector<8x256xf32> to vector<8x8xf32>
    %28 = vector.extract_strided_slice %12 {offsets = [0, 0], sizes = [8, 248], strides = [1, 1]} : vector<8x256xf32> to vector<8x248xf32>
    %29 = tpu.concatenate %27, %28 in 1 : vector<8x8xf32>, vector<8x248xf32> -> vector<8x256xf32>
    %30 = vector.extract_strided_slice %2 {offsets = [2, 0, 0], sizes = [1, 1, 256], strides = [1, 1, 1]} : vector<9x1x256xf32> to vector<1x1x256xf32>
    %31 = vector.shape_cast %30 : vector<1x1x256xf32> to vector<1x256xf32>
    %32 = vector.broadcast %31 : vector<1x256xf32> to vector<8x256xf32>
    %33 = arith.mulf %29, %32 : vector<8x256xf32>
    %34 = vector.extract_strided_slice %12 {offsets = [0, 255], sizes = [8, 1], strides = [1, 1]} : vector<8x256xf32> to vector<8x1xf32>
    %35 = vector.extract_strided_slice %12 {offsets = [0, 0], sizes = [8, 255], strides = [1, 1]} : vector<8x256xf32> to vector<8x255xf32>
    %36 = tpu.concatenate %34, %35 in 1 : vector<8x1xf32>, vector<8x255xf32> -> vector<8x256xf32>
    %37 = vector.extract_strided_slice %2 {offsets = [3, 0, 0], sizes = [1, 1, 256], strides = [1, 1, 1]} : vector<9x1x256xf32> to vector<1x1x256xf32>
    %38 = vector.shape_cast %37 : vector<1x1x256xf32> to vector<1x256xf32>
    %39 = vector.broadcast %38 : vector<1x256xf32> to vector<8x256xf32>
    %40 = arith.mulf %36, %39 : vector<8x256xf32>
    %41 = vector.extract_strided_slice %2 {offsets = [4, 0, 0], sizes = [1, 1, 256], strides = [1, 1, 1]} : vector<9x1x256xf32> to vector<1x1x256xf32>
    %42 = vector.shape_cast %41 : vector<1x1x256xf32> to vector<1x256xf32>
    %43 = vector.broadcast %42 : vector<1x256xf32> to vector<8x256xf32>
    %44 = arith.mulf %12, %43 : vector<8x256xf32>
    %45 = vector.extract_strided_slice %12 {offsets = [0, 1], sizes = [8, 255], strides = [1, 1]} : vector<8x256xf32> to vector<8x255xf32>
    %46 = vector.extract_strided_slice %12 {offsets = [0, 0], sizes = [8, 1], strides = [1, 1]} : vector<8x256xf32> to vector<8x1xf32>
    %47 = tpu.concatenate %45, %46 in 1 : vector<8x255xf32>, vector<8x1xf32> -> vector<8x256xf32>
    %48 = vector.extract_strided_slice %2 {offsets = [5, 0, 0], sizes = [1, 1, 256], strides = [1, 1, 1]} : vector<9x1x256xf32> to vector<1x1x256xf32>
    %49 = vector.shape_cast %48 : vector<1x1x256xf32> to vector<1x256xf32>
    %50 = vector.broadcast %49 : vector<1x256xf32> to vector<8x256xf32>
    %51 = arith.mulf %47, %50 : vector<8x256xf32>
    %52 = vector.extract_strided_slice %12 {offsets = [0, 8], sizes = [8, 248], strides = [1, 1]} : vector<8x256xf32> to vector<8x248xf32>
    %53 = vector.extract_strided_slice %12 {offsets = [0, 0], sizes = [8, 8], strides = [1, 1]} : vector<8x256xf32> to vector<8x8xf32>
    %54 = tpu.concatenate %52, %53 in 1 : vector<8x248xf32>, vector<8x8xf32> -> vector<8x256xf32>
    %55 = vector.extract_strided_slice %2 {offsets = [6, 0, 0], sizes = [1, 1, 256], strides = [1, 1, 1]} : vector<9x1x256xf32> to vector<1x1x256xf32>
    %56 = vector.shape_cast %55 : vector<1x1x256xf32> to vector<1x256xf32>
    %57 = vector.broadcast %56 : vector<1x256xf32> to vector<8x256xf32>
    %58 = arith.mulf %54, %57 : vector<8x256xf32>
    %59 = vector.extract_strided_slice %12 {offsets = [0, 9], sizes = [8, 247], strides = [1, 1]} : vector<8x256xf32> to vector<8x247xf32>
    %60 = vector.extract_strided_slice %12 {offsets = [0, 0], sizes = [8, 9], strides = [1, 1]} : vector<8x256xf32> to vector<8x9xf32>
    %61 = tpu.concatenate %59, %60 in 1 : vector<8x247xf32>, vector<8x9xf32> -> vector<8x256xf32>
    %62 = vector.extract_strided_slice %2 {offsets = [7, 0, 0], sizes = [1, 1, 256], strides = [1, 1, 1]} : vector<9x1x256xf32> to vector<1x1x256xf32>
    %63 = vector.shape_cast %62 : vector<1x1x256xf32> to vector<1x256xf32>
    %64 = vector.broadcast %63 : vector<1x256xf32> to vector<8x256xf32>
    %65 = arith.mulf %61, %64 : vector<8x256xf32>
    %66 = vector.extract_strided_slice %12 {offsets = [0, 10], sizes = [8, 246], strides = [1, 1]} : vector<8x256xf32> to vector<8x246xf32>
    %67 = vector.extract_strided_slice %12 {offsets = [0, 0], sizes = [8, 10], strides = [1, 1]} : vector<8x256xf32> to vector<8x10xf32>
    %68 = tpu.concatenate %66, %67 in 1 : vector<8x246xf32>, vector<8x10xf32> -> vector<8x256xf32>
    %69 = vector.extract_strided_slice %2 {offsets = [8, 0, 0], sizes = [1, 1, 256], strides = [1, 1, 1]} : vector<9x1x256xf32> to vector<1x1x256xf32>
    %70 = vector.shape_cast %69 : vector<1x1x256xf32> to vector<1x256xf32>
    %71 = vector.broadcast %70 : vector<1x256xf32> to vector<8x256xf32>
    %72 = arith.mulf %68, %71 : vector<8x256xf32>
    %73 = tpu.concatenate %19, %26, %33, %40, %44, %51, %58, %65, %72 in 0 : vector<8x256xf32>, vector<8x256xf32>, vector<8x256xf32>, vector<8x256xf32>, vector<8x256xf32>, vector<8x256xf32>, vector<8x256xf32>, vector<8x256xf32>, vector<8x256xf32> -> vector<72x256xf32>
    %c0_12 = arith.constant 0 : index
    %c0_13 = arith.constant 0 : index
    %74 = vector.load %arg6[%c0_12, %c0_13] : memref<8x72xf32, #tpu.memory_space<vmem>>, vector<8x72xf32>
    %cst_14 = arith.constant dense<0.000000e+00> : vector<8x256xf32>
    %75 = tpu.matmul %74, %73, %cst_14 {dimension_numbers = #tpu.dot_dimension_numbers<[1], [0], [0], [1], [0, 0, 1, 1], [], []>} : vector<8x72xf32>, vector<72x256xf32>, vector<8x256xf32> -> vector<8x256xf32>
    %c0_15 = arith.constant 0 : index
    %c0_16 = arith.constant 0 : index
    %76 = vector.load %arg7[%c0_15, %c0_16] : memref<8x1xf32, #tpu.memory_space<vmem>>, vector<8x1xf32>
    %77 = vector.broadcast %76 : vector<8x1xf32> to vector<8x256xf32>
    %78 = arith.addf %75, %77 : vector<8x256xf32>
    %cst_17 = arith.constant 5.000000e-01 : f32
    %79 = vector.broadcast %cst_17 : f32 to vector<8x256xf32>
    %80 = arith.mulf %79, %78 : vector<8x256xf32>
    %cst_18 = arith.constant 0.707106769 : f32
    %81 = vector.broadcast %cst_18 : f32 to vector<8x256xf32>
    %82 = arith.mulf %78, %81 : vector<8x256xf32>
    %83 = math.absf %82 : vector<8x256xf32>
    %cst_19 = arith.constant 5.000000e-01 : f32
    %84 = vector.broadcast %cst_19 : f32 to vector<8x256xf32>
    %85 = arith.mulf %84, %83 : vector<8x256xf32>
    %cst_20 = arith.constant 1.000000e+00 : f32
    %86 = vector.broadcast %cst_20 : f32 to vector<8x256xf32>
    %87 = arith.addf %86, %85 : vector<8x256xf32>
    %cst_21 = arith.constant 1.000000e+00 : f32
    %88 = vector.broadcast %cst_21 : f32 to vector<8x256xf32>
    %89 = arith.divf %88, %87 : vector<8x256xf32>
    %cst_22 = arith.constant 0.170872763 : f32
    %90 = vector.broadcast %cst_22 : f32 to vector<8x256xf32>
    %91 = arith.mulf %89, %90 : vector<8x256xf32>
    %cst_23 = arith.constant -0.822152256 : f32
    %92 = vector.broadcast %cst_23 : f32 to vector<8x256xf32>
    %93 = arith.addf %92, %91 : vector<8x256xf32>
    %94 = arith.mulf %89, %93 : vector<8x256xf32>
    %cst_24 = arith.constant 1.48851585 : f32
    %95 = vector.broadcast %cst_24 : f32 to vector<8x256xf32>
    %96 = arith.addf %95, %94 : vector<8x256xf32>
    %97 = arith.mulf %89, %96 : vector<8x256xf32>
    %cst_25 = arith.constant -1.13520396 : f32
    %98 = vector.broadcast %cst_25 : f32 to vector<8x256xf32>
    %99 = arith.addf %98, %97 : vector<8x256xf32>
    %100 = arith.mulf %89, %99 : vector<8x256xf32>
    %cst_26 = arith.constant 0.278868079 : f32
    %101 = vector.broadcast %cst_26 : f32 to vector<8x256xf32>
    %102 = arith.addf %101, %100 : vector<8x256xf32>
    %103 = arith.mulf %89, %102 : vector<8x256xf32>
    %cst_27 = arith.constant -0.186288059 : f32
    %104 = vector.broadcast %cst_27 : f32 to vector<8x256xf32>
    %105 = arith.addf %104, %103 : vector<8x256xf32>
    %106 = arith.mulf %89, %105 : vector<8x256xf32>
    %cst_28 = arith.constant 0.0967841818 : f32
    %107 = vector.broadcast %cst_28 : f32 to vector<8x256xf32>
    %108 = arith.addf %107, %106 : vector<8x256xf32>
    %109 = arith.mulf %89, %108 : vector<8x256xf32>
    %cst_29 = arith.constant 0.374091953 : f32
    %110 = vector.broadcast %cst_29 : f32 to vector<8x256xf32>
    %111 = arith.addf %110, %109 : vector<8x256xf32>
    %112 = arith.mulf %89, %111 : vector<8x256xf32>
    %cst_30 = arith.constant 1.00002372 : f32
    %113 = vector.broadcast %cst_30 : f32 to vector<8x256xf32>
    %114 = arith.addf %113, %112 : vector<8x256xf32>
    %115 = arith.mulf %89, %114 : vector<8x256xf32>
    %cst_31 = arith.constant -1.26551223 : f32
    %116 = vector.broadcast %cst_31 : f32 to vector<8x256xf32>
    %117 = arith.addf %116, %115 : vector<8x256xf32>
    %cst_32 = arith.constant 0.000000e+00 : f32
    %118 = vector.broadcast %cst_32 : f32 to vector<8x256xf32>
    %119 = arith.subf %118, %83 : vector<8x256xf32>
    %120 = arith.mulf %119, %83 : vector<8x256xf32>
    %121 = arith.addf %120, %117 : vector<8x256xf32>
    %122 = math.exp %121 : vector<8x256xf32>
    %123 = arith.mulf %89, %122 : vector<8x256xf32>
    %cst_33 = arith.constant 0.000000e+00 : f32
    %124 = vector.broadcast %cst_33 : f32 to vector<8x256xf32>
    %125 = arith.cmpf oge, %82, %124 : vector<8x256xf32>
    %cst_34 = arith.constant 1.000000e+00 : f32
    %126 = vector.broadcast %cst_34 : f32 to vector<8x256xf32>
    %127 = arith.subf %126, %123 : vector<8x256xf32>
    %cst_35 = arith.constant 1.000000e+00 : f32
    %128 = vector.broadcast %cst_35 : f32 to vector<8x256xf32>
    %129 = arith.subf %123, %128 : vector<8x256xf32>
    %130 = arith.select %125, %127, %129 : vector<8x256xi1>, vector<8x256xf32>
    %cst_36 = arith.constant 1.000000e+00 : f32
    %131 = vector.broadcast %cst_36 : f32 to vector<8x256xf32>
    %132 = arith.addf %131, %130 : vector<8x256xf32>
    %133 = arith.mulf %80, %132 : vector<8x256xf32>
    %134 = vector.extract_strided_slice %133 {offsets = [0, 246], sizes = [8, 10], strides = [1, 1]} : vector<8x256xf32> to vector<8x10xf32>
    %135 = vector.extract_strided_slice %133 {offsets = [0, 0], sizes = [8, 246], strides = [1, 1]} : vector<8x256xf32> to vector<8x246xf32>
    %136 = tpu.concatenate %134, %135 in 1 : vector<8x10xf32>, vector<8x246xf32> -> vector<8x256xf32>
    %137 = vector.extract_strided_slice %2 {offsets = [0, 0, 0], sizes = [1, 1, 256], strides = [1, 1, 1]} : vector<9x1x256xf32> to vector<1x1x256xf32>
    %138 = vector.shape_cast %137 : vector<1x1x256xf32> to vector<1x256xf32>
    %139 = vector.broadcast %138 : vector<1x256xf32> to vector<8x256xf32>
    %140 = arith.mulf %136, %139 : vector<8x256xf32>
    %141 = vector.extract_strided_slice %133 {offsets = [0, 247], sizes = [8, 9], strides = [1, 1]} : vector<8x256xf32> to vector<8x9xf32>
    %142 = vector.extract_strided_slice %133 {offsets = [0, 0], sizes = [8, 247], strides = [1, 1]} : vector<8x256xf32> to vector<8x247xf32>
    %143 = tpu.concatenate %141, %142 in 1 : vector<8x9xf32>, vector<8x247xf32> -> vector<8x256xf32>
    %144 = vector.extract_strided_slice %2 {offsets = [1, 0, 0], sizes = [1, 1, 256], strides = [1, 1, 1]} : vector<9x1x256xf32> to vector<1x1x256xf32>
    %145 = vector.shape_cast %144 : vector<1x1x256xf32> to vector<1x256xf32>
    %146 = vector.broadcast %145 : vector<1x256xf32> to vector<8x256xf32>
    %147 = arith.mulf %143, %146 : vector<8x256xf32>
    %148 = vector.extract_strided_slice %133 {offsets = [0, 248], sizes = [8, 8], strides = [1, 1]} : vector<8x256xf32> to vector<8x8xf32>
    %149 = vector.extract_strided_slice %133 {offsets = [0, 0], sizes = [8, 248], strides = [1, 1]} : vector<8x256xf32> to vector<8x248xf32>
    %150 = tpu.concatenate %148, %149 in 1 : vector<8x8xf32>, vector<8x248xf32> -> vector<8x256xf32>
    %151 = vector.extract_strided_slice %2 {offsets = [2, 0, 0], sizes = [1, 1, 256], strides = [1, 1, 1]} : vector<9x1x256xf32> to vector<1x1x256xf32>
    %152 = vector.shape_cast %151 : vector<1x1x256xf32> to vector<1x256xf32>
    %153 = vector.broadcast %152 : vector<1x256xf32> to vector<8x256xf32>
    %154 = arith.mulf %150, %153 : vector<8x256xf32>
    %155 = vector.extract_strided_slice %133 {offsets = [0, 255], sizes = [8, 1], strides = [1, 1]} : vector<8x256xf32> to vector<8x1xf32>
    %156 = vector.extract_strided_slice %133 {offsets = [0, 0], sizes = [8, 255], strides = [1, 1]} : vector<8x256xf32> to vector<8x255xf32>
    %157 = tpu.concatenate %155, %156 in 1 : vector<8x1xf32>, vector<8x255xf32> -> vector<8x256xf32>
    %158 = vector.extract_strided_slice %2 {offsets = [3, 0, 0], sizes = [1, 1, 256], strides = [1, 1, 1]} : vector<9x1x256xf32> to vector<1x1x256xf32>
    %159 = vector.shape_cast %158 : vector<1x1x256xf32> to vector<1x256xf32>
    %160 = vector.broadcast %159 : vector<1x256xf32> to vector<8x256xf32>
    %161 = arith.mulf %157, %160 : vector<8x256xf32>
    %162 = vector.extract_strided_slice %2 {offsets = [4, 0, 0], sizes = [1, 1, 256], strides = [1, 1, 1]} : vector<9x1x256xf32> to vector<1x1x256xf32>
    %163 = vector.shape_cast %162 : vector<1x1x256xf32> to vector<1x256xf32>
    %164 = vector.broadcast %163 : vector<1x256xf32> to vector<8x256xf32>
    %165 = arith.mulf %133, %164 : vector<8x256xf32>
    %166 = vector.extract_strided_slice %133 {offsets = [0, 1], sizes = [8, 255], strides = [1, 1]} : vector<8x256xf32> to vector<8x255xf32>
    %167 = vector.extract_strided_slice %133 {offsets = [0, 0], sizes = [8, 1], strides = [1, 1]} : vector<8x256xf32> to vector<8x1xf32>
    %168 = tpu.concatenate %166, %167 in 1 : vector<8x255xf32>, vector<8x1xf32> -> vector<8x256xf32>
    %169 = vector.extract_strided_slice %2 {offsets = [5, 0, 0], sizes = [1, 1, 256], strides = [1, 1, 1]} : vector<9x1x256xf32> to vector<1x1x256xf32>
    %170 = vector.shape_cast %169 : vector<1x1x256xf32> to vector<1x256xf32>
    %171 = vector.broadcast %170 : vector<1x256xf32> to vector<8x256xf32>
    %172 = arith.mulf %168, %171 : vector<8x256xf32>
    %173 = vector.extract_strided_slice %133 {offsets = [0, 8], sizes = [8, 248], strides = [1, 1]} : vector<8x256xf32> to vector<8x248xf32>
    %174 = vector.extract_strided_slice %133 {offsets = [0, 0], sizes = [8, 8], strides = [1, 1]} : vector<8x256xf32> to vector<8x8xf32>
    %175 = tpu.concatenate %173, %174 in 1 : vector<8x248xf32>, vector<8x8xf32> -> vector<8x256xf32>
    %176 = vector.extract_strided_slice %2 {offsets = [6, 0, 0], sizes = [1, 1, 256], strides = [1, 1, 1]} : vector<9x1x256xf32> to vector<1x1x256xf32>
    %177 = vector.shape_cast %176 : vector<1x1x256xf32> to vector<1x256xf32>
    %178 = vector.broadcast %177 : vector<1x256xf32> to vector<8x256xf32>
    %179 = arith.mulf %175, %178 : vector<8x256xf32>
    %180 = vector.extract_strided_slice %133 {offsets = [0, 9], sizes = [8, 247], strides = [1, 1]} : vector<8x256xf32> to vector<8x247xf32>
    %181 = vector.extract_strided_slice %133 {offsets = [0, 0], sizes = [8, 9], strides = [1, 1]} : vector<8x256xf32> to vector<8x9xf32>
    %182 = tpu.concatenate %180, %181 in 1 : vector<8x247xf32>, vector<8x9xf32> -> vector<8x256xf32>
    %183 = vector.extract_strided_slice %2 {offsets = [7, 0, 0], sizes = [1, 1, 256], strides = [1, 1, 1]} : vector<9x1x256xf32> to vector<1x1x256xf32>
    %184 = vector.shape_cast %183 : vector<1x1x256xf32> to vector<1x256xf32>
    %185 = vector.broadcast %184 : vector<1x256xf32> to vector<8x256xf32>
    %186 = arith.mulf %182, %185 : vector<8x256xf32>
    %187 = vector.extract_strided_slice %133 {offsets = [0, 10], sizes = [8, 246], strides = [1, 1]} : vector<8x256xf32> to vector<8x246xf32>
    %188 = vector.extract_strided_slice %133 {offsets = [0, 0], sizes = [8, 10], strides = [1, 1]} : vector<8x256xf32> to vector<8x10xf32>
    %189 = tpu.concatenate %187, %188 in 1 : vector<8x246xf32>, vector<8x10xf32> -> vector<8x256xf32>
    %190 = vector.extract_strided_slice %2 {offsets = [8, 0, 0], sizes = [1, 1, 256], strides = [1, 1, 1]} : vector<9x1x256xf32> to vector<1x1x256xf32>
    %191 = vector.shape_cast %190 : vector<1x1x256xf32> to vector<1x256xf32>
    %192 = vector.broadcast %191 : vector<1x256xf32> to vector<8x256xf32>
    %193 = arith.mulf %189, %192 : vector<8x256xf32>
    %194 = tpu.concatenate %140, %147, %154, %161, %165, %172, %179, %186, %193 in 0 : vector<8x256xf32>, vector<8x256xf32>, vector<8x256xf32>, vector<8x256xf32>, vector<8x256xf32>, vector<8x256xf32>, vector<8x256xf32>, vector<8x256xf32>, vector<8x256xf32> -> vector<72x256xf32>
    %c0_37 = arith.constant 0 : index
    %c0_38 = arith.constant 0 : index
    %195 = vector.load %arg8[%c0_37, %c0_38] : memref<8x72xf32, #tpu.memory_space<vmem>>, vector<8x72xf32>
    %cst_39 = arith.constant dense<0.000000e+00> : vector<8x256xf32>
    %196 = tpu.matmul %195, %194, %cst_39 {dimension_numbers = #tpu.dot_dimension_numbers<[1], [0], [0], [1], [0, 0, 1, 1], [], []>} : vector<8x72xf32>, vector<72x256xf32>, vector<8x256xf32> -> vector<8x256xf32>
    %c0_40 = arith.constant 0 : index
    %c0_41 = arith.constant 0 : index
    %197 = vector.load %arg9[%c0_40, %c0_41] : memref<8x1xf32, #tpu.memory_space<vmem>>, vector<8x1xf32>
    %198 = vector.broadcast %197 : vector<8x1xf32> to vector<8x256xf32>
    %199 = arith.addf %196, %198 : vector<8x256xf32>
    %cst_42 = arith.constant 5.000000e-01 : f32
    %200 = vector.broadcast %cst_42 : f32 to vector<8x256xf32>
    %201 = arith.mulf %200, %199 : vector<8x256xf32>
    %cst_43 = arith.constant 0.707106769 : f32
    %202 = vector.broadcast %cst_43 : f32 to vector<8x256xf32>
    %203 = arith.mulf %199, %202 : vector<8x256xf32>
    %204 = math.absf %203 : vector<8x256xf32>
    %cst_44 = arith.constant 5.000000e-01 : f32
    %205 = vector.broadcast %cst_44 : f32 to vector<8x256xf32>
    %206 = arith.mulf %205, %204 : vector<8x256xf32>
    %cst_45 = arith.constant 1.000000e+00 : f32
    %207 = vector.broadcast %cst_45 : f32 to vector<8x256xf32>
    %208 = arith.addf %207, %206 : vector<8x256xf32>
    %cst_46 = arith.constant 1.000000e+00 : f32
    %209 = vector.broadcast %cst_46 : f32 to vector<8x256xf32>
    %210 = arith.divf %209, %208 : vector<8x256xf32>
    %cst_47 = arith.constant 0.170872763 : f32
    %211 = vector.broadcast %cst_47 : f32 to vector<8x256xf32>
    %212 = arith.mulf %210, %211 : vector<8x256xf32>
    %cst_48 = arith.constant -0.822152256 : f32
    %213 = vector.broadcast %cst_48 : f32 to vector<8x256xf32>
    %214 = arith.addf %213, %212 : vector<8x256xf32>
    %215 = arith.mulf %210, %214 : vector<8x256xf32>
    %cst_49 = arith.constant 1.48851585 : f32
    %216 = vector.broadcast %cst_49 : f32 to vector<8x256xf32>
    %217 = arith.addf %216, %215 : vector<8x256xf32>
    %218 = arith.mulf %210, %217 : vector<8x256xf32>
    %cst_50 = arith.constant -1.13520396 : f32
    %219 = vector.broadcast %cst_50 : f32 to vector<8x256xf32>
    %220 = arith.addf %219, %218 : vector<8x256xf32>
    %221 = arith.mulf %210, %220 : vector<8x256xf32>
    %cst_51 = arith.constant 0.278868079 : f32
    %222 = vector.broadcast %cst_51 : f32 to vector<8x256xf32>
    %223 = arith.addf %222, %221 : vector<8x256xf32>
    %224 = arith.mulf %210, %223 : vector<8x256xf32>
    %cst_52 = arith.constant -0.186288059 : f32
    %225 = vector.broadcast %cst_52 : f32 to vector<8x256xf32>
    %226 = arith.addf %225, %224 : vector<8x256xf32>
    %227 = arith.mulf %210, %226 : vector<8x256xf32>
    %cst_53 = arith.constant 0.0967841818 : f32
    %228 = vector.broadcast %cst_53 : f32 to vector<8x256xf32>
    %229 = arith.addf %228, %227 : vector<8x256xf32>
    %230 = arith.mulf %210, %229 : vector<8x256xf32>
    %cst_54 = arith.constant 0.374091953 : f32
    %231 = vector.broadcast %cst_54 : f32 to vector<8x256xf32>
    %232 = arith.addf %231, %230 : vector<8x256xf32>
    %233 = arith.mulf %210, %232 : vector<8x256xf32>
    %cst_55 = arith.constant 1.00002372 : f32
    %234 = vector.broadcast %cst_55 : f32 to vector<8x256xf32>
    %235 = arith.addf %234, %233 : vector<8x256xf32>
    %236 = arith.mulf %210, %235 : vector<8x256xf32>
    %cst_56 = arith.constant -1.26551223 : f32
    %237 = vector.broadcast %cst_56 : f32 to vector<8x256xf32>
    %238 = arith.addf %237, %236 : vector<8x256xf32>
    %cst_57 = arith.constant 0.000000e+00 : f32
    %239 = vector.broadcast %cst_57 : f32 to vector<8x256xf32>
    %240 = arith.subf %239, %204 : vector<8x256xf32>
    %241 = arith.mulf %240, %204 : vector<8x256xf32>
    %242 = arith.addf %241, %238 : vector<8x256xf32>
    %243 = math.exp %242 : vector<8x256xf32>
    %244 = arith.mulf %210, %243 : vector<8x256xf32>
    %cst_58 = arith.constant 0.000000e+00 : f32
    %245 = vector.broadcast %cst_58 : f32 to vector<8x256xf32>
    %246 = arith.cmpf oge, %203, %245 : vector<8x256xf32>
    %cst_59 = arith.constant 1.000000e+00 : f32
    %247 = vector.broadcast %cst_59 : f32 to vector<8x256xf32>
    %248 = arith.subf %247, %244 : vector<8x256xf32>
    %cst_60 = arith.constant 1.000000e+00 : f32
    %249 = vector.broadcast %cst_60 : f32 to vector<8x256xf32>
    %250 = arith.subf %244, %249 : vector<8x256xf32>
    %251 = arith.select %246, %248, %250 : vector<8x256xi1>, vector<8x256xf32>
    %cst_61 = arith.constant 1.000000e+00 : f32
    %252 = vector.broadcast %cst_61 : f32 to vector<8x256xf32>
    %253 = arith.addf %252, %251 : vector<8x256xf32>
    %254 = arith.mulf %201, %253 : vector<8x256xf32>
    %255 = vector.extract_strided_slice %254 {offsets = [0, 0], sizes = [4, 256], strides = [1, 1]} : vector<8x256xf32> to vector<4x256xf32>
    %256 = vector.extract_strided_slice %254 {offsets = [4, 0], sizes = [4, 256], strides = [1, 1]} : vector<8x256xf32> to vector<4x256xf32>
    %257 = tpu.concatenate %255, %256 in 1 : vector<4x256xf32>, vector<4x256xf32> -> vector<4x512xf32>
    %c0_62 = arith.constant 0 : index
    %c0_63 = arith.constant 0 : index
    %258 = vector.load %arg10[%c0_62, %c0_63] : memref<512x256xf32, #tpu.memory_space<vmem>>, vector<512x256xf32>
    %cst_64 = arith.constant dense<0.000000e+00> : vector<4x256xf32>
    %259 = tpu.matmul %257, %258, %cst_64 {dimension_numbers = #tpu.dot_dimension_numbers<[1], [0], [0], [1], [0, 0, 1, 1], [], []>} : vector<4x512xf32>, vector<512x256xf32>, vector<4x256xf32> -> vector<4x256xf32>
    %c0_65 = arith.constant 0 : index
    %c0_66 = arith.constant 0 : index
    %260 = vector.load %arg11[%c0_65, %c0_66] : memref<4x4xf32, #tpu.memory_space<vmem>>, vector<4x4xf32>
    %cst_67 = arith.constant dense<0.000000e+00> : vector<4x256xf32>
    %261 = tpu.matmul %260, %259, %cst_67 {dimension_numbers = #tpu.dot_dimension_numbers<[1], [0], [0], [1], [0, 0, 1, 1], [], []>} : vector<4x4xf32>, vector<4x256xf32>, vector<4x256xf32> -> vector<4x256xf32>
    %c0_68 = arith.constant 0 : index
    %c0_69 = arith.constant 0 : index
    %262 = vector.load %arg12[%c0_68, %c0_69] : memref<4x1xf32, #tpu.memory_space<vmem>>, vector<4x1xf32>
    %263 = vector.broadcast %262 : vector<4x1xf32> to vector<4x256xf32>
    %264 = arith.addf %261, %263 : vector<4x256xf32>
    %c0_70 = arith.constant 0 : index
    %c0_71 = arith.constant 0 : index
    %c0_72 = arith.constant 0 : index
    %265 = vector.load %arg13[%c0_70, %c0_71, %c0_72] : memref<1x4x256xf32, #tpu.memory_space<vmem>>, vector<1x4x256xf32>
    %266 = vector.shape_cast %265 : vector<1x4x256xf32> to vector<4x256xf32>
    %267 = vector.shape_cast %264 : vector<4x256xf32> to vector<1x4x256xf32>
    tpu.vector_store %arg13[%c0_70, %c0_71, %c0_72], %267 {strides = array<i32>} : memref<1x4x256xf32, #tpu.memory_space<vmem>>, vector<1x4x256xf32>,
    return
  }
  func.func @transform_0(%arg0: i32) -> (i32, i32, i32) {
    %c0_i32 = arith.constant 0 : i32
    %c0_i32_0 = arith.constant 0 : i32
    %c0_i32_1 = arith.constant 0 : i32
    return %arg0, %c0_i32, %c0_i32_0 : i32, i32, i32
  }
  func.func @transform_1(%arg0: i32) -> (i32, i32) {
    %c0_i32 = arith.constant 0 : i32
    %c0_i32_0 = arith.constant 0 : i32
    %c0_i32_1 = arith.constant 0 : i32
    return %c0_i32, %c0_i32_0 : i32, i32
  }
  func.func @transform_2(%arg0: i32) -> (i32, i32) {
    %c0_i32 = arith.constant 0 : i32
    %c0_i32_0 = arith.constant 0 : i32
    %c0_i32_1 = arith.constant 0 : i32
    return %c0_i32, %c0_i32_0 : i32, i32
  }
  func.func @transform_3(%arg0: i32) -> (i32, i32) {
    %c0_i32 = arith.constant 0 : i32
    %c0_i32_0 = arith.constant 0 : i32
    %c0_i32_1 = arith.constant 0 : i32
    return %c0_i32, %c0_i32_0 : i32, i32
  }
  func.func @transform_4(%arg0: i32) -> (i32, i32, i32) {
    %c0_i32 = arith.constant 0 : i32
    %c0_i32_0 = arith.constant 0 : i32
    %c0_i32_1 = arith.constant 0 : i32
    %c0_i32_2 = arith.constant 0 : i32
    return %c0_i32, %c0_i32_0, %c0_i32_1 : i32, i32, i32
  }
  func.func @transform_5(%arg0: i32) -> (i32, i32) {
    %c0_i32 = arith.constant 0 : i32
    %c0_i32_0 = arith.constant 0 : i32
    %c0_i32_1 = arith.constant 0 : i32
    return %c0_i32, %c0_i32_0 : i32, i32
  }
  func.func @transform_6(%arg0: i32) -> (i32, i32) {
    %c0_i32 = arith.constant 0 : i32
    %c0_i32_0 = arith.constant 0 : i32
    %c0_i32_1 = arith.constant 0 : i32
    return %c0_i32, %c0_i32_0 : i32, i32
  }
  func.func @transform_7(%arg0: i32) -> (i32, i32) {
    %c0_i32 = arith.constant 0 : i32
    %c0_i32_0 = arith.constant 0 : i32
    %c0_i32_1 = arith.constant 0 : i32
    return %c0_i32, %c0_i32_0 : i32, i32
  }
  func.func @transform_8(%arg0: i32) -> (i32, i32) {
    %c0_i32 = arith.constant 0 : i32
    %c0_i32_0 = arith.constant 0 : i32
    %c0_i32_1 = arith.constant 0 : i32
    return %c0_i32, %c0_i32_0 : i32, i32
  }
  func.func @transform_9(%arg0: i32) -> (i32, i32) {
    %c0_i32 = arith.constant 0 : i32
    %c0_i32_0 = arith.constant 0 : i32
    %c0_i32_1 = arith.constant 0 : i32
    return %c0_i32, %c0_i32_0 : i32, i32
  }
  func.func @transform_10(%arg0: i32) -> (i32, i32) {
    %c0_i32 = arith.constant 0 : i32
    %c0_i32_0 = arith.constant 0 : i32
    %c0_i32_1 = arith.constant 0 : i32
    return %c0_i32, %c0_i32_0 : i32, i32
  }
  func.func @transform_11(%arg0: i32) -> (i32, i32) {
    %c0_i32 = arith.constant 0 : i32
    %c0_i32_0 = arith.constant 0 : i32
    %c0_i32_1 = arith.constant 0 : i32
    return %c0_i32, %c0_i32_0 : i32, i32
  }
  func.func @transform_12(%arg0: i32) -> (i32, i32, i32) {
    %c0_i32 = arith.constant 0 : i32
    %c0_i32_0 = arith.constant 0 : i32
    %c0_i32_1 = arith.constant 0 : i32
    return %arg0, %c0_i32, %c0_i32_0 : i32, i32, i32
  }
}

</mosaic_0001>

<bundles_post_ra>
// kernel: integer_pow.0
= control target key start
LH: loop header
LB: loop body
LE: loop exit
PB: predicated region body
PF: predicated region fallthrough
CT: control target
= control target key end

     0   :  { %s100_s0 = inlined_call_operand.vmem [shape: f32[4,4,1,1], index: 0, kind: input, shape index: {}, may-alias: {0,1}]   ;;  %s101_s1 = inlined_call_operand.vmem [shape: f32[4,4,1,1], index: 1, kind: input, shape index: {}, may-alias: {0,1}]   ;;  %s102_s2 = inlined_call_operand.vmem [shape: f32[4,4,1,1], index: 2, kind: output, shape index: {}]  }
   0x1   :  { %v3_v0 = vld [vmem:[%s100_s0] sm:$0x1]  ;;  %v40_v2 = vld [vmem:[%s100_s0 + $0x1] sm:$0x1]  ;;  %v43_v5 = vld [vmem:[%s100_s0 + $0x2] sm:$0x1] }
   0x2   :  { %v4_v1 = vld [vmem:[%s101_s1] sm:$0x1]  ;;  %v41_v4 = vld [vmem:[%s101_s1 + $0x1] sm:$0x1]  ;;  %v44_v6 = vld [vmem:[%s101_s1 + $0x2] sm:$0x1] }
   0x3   :  { %v7_v3 = vmul.f32 %v4_v1, %v3_v0  ;;  %v16_v7 = vmul.f32 %v41_v4, %v40_v2  ;;  %v26_v8 = vmul.f32 %v44_v6, %v43_v5  ;;  %v46_v9 = vld [vmem:[%s100_s0 + $0x3] sm:$0x1] }
   0x4   :  { %v47_v10 = vld [vmem:[%s101_s1 + $0x3] sm:$0x1] }
   0x5   :  { %9 = vst [vmem:[%s102_s2] sm:$0x1] %v7_v3  ;;  %v36_v11 = vmul.f32 %v47_v10, %v46_v9 }
   0x6   :  { %42 = vst [vmem:[%s102_s2 + $0x1] sm:$0x1] %v16_v7 }
   0x7   :  { %45 = vst [vmem:[%s102_s2 + $0x2] sm:$0x1] %v26_v8 }
   0x8   :  { %48 = vst [vmem:[%s102_s2 + $0x3] sm:$0x1] %v36_v11 }

// kernel: simple_ffc_block.1
= control target key start
LH: loop header
LB: loop body
LE: loop exit
PB: predicated region body
PF: predicated region fallthrough
CT: control target
= control target key end

     0   :  { %17 = vsyncpa [#allocation3], 0  ;;  %s2474_s0 = inlined_call_operand.vmem [shape: f32[2,4,256], index: 0, kind: input, shape index: {}]   ;;  %s2475_s1 = inlined_call_operand.vmem [shape: f32[4,4], index: 1, kind: input, shape index: {}]   ;;  %s2476_s2 = inlined_call_operand.vmem [shape: f32[4,1], index: 2, kind: input, shape index: {}]   ;;  %s2477_s3 = inlined_call_operand.hbm [shape: f32[256,512], index: 3, kind: input, shape index: {}]   ;;  %s2478_s4 = inlined_call_operand.vmem [shape: f32[9,1,256], index: 4, kind: input, shape index: {}]   ;;  %s2479_s5 = inlined_call_operand.vmem [shape: f32[8,72], index: 5, kind: input, shape index: {}]   ;;  %s2480_s6 = inlined_call_operand.vmem [shape: f32[8,1], index: 6, kind: input, shape index: {}]   ;;  %s2481_s7 = inlined_call_operand.vmem [shape: f32[8,72], index: 7, kind: input, shape index: {}]   ;;  %s2482_s8 = inlined_call_operand.vmem [shape: f32[8,1], index: 8, kind: input, shape index: {}]   ;;  %s2483_s9 = inlined_call_operand.hbm [shape: f32[512,256], index: 9, kind: input, shape index: {}]   ;;  %s2484_s10 = inlined_call_operand.vmem [shape: f32[4,4], index: 10, kind: input, shape index: {}]   ;;  %s2485_s11 = inlined_call_operand.vmem [shape: f32[4,1], index: 11, kind: input, shape index: {}]   ;;  %s2486_s12 = inlined_call_operand.vmem [shape: f32[2,4,256], index: 12, kind: output, shape index: {}]  }
   0x1   :  { %18 = vsyncpa [#allocation5], 0  ;;  %s2035_s21 = smov 0  }
   0x2 LB: > { %s329_s24 = sshll.u32 %s2477_s3, 4  ;;  %s2044_s25 = sadd.s32 4294967295, %s1953_s21   ;;  %s1953_s21 = sphi %s2035_s21, %s24_s21   ;;  %s330_s24 = int_to_ptr.hbm [resolvable:$true] %s329_s24 }
   0x3   : > { %p1787_p0 = scmp.ge.s32.totalorder %s1953_s21, 1  ;;  %p312_p1 = scmp.lt.s32.totalorder %s1953_s21, 3 }
   0x4   : > { %p1833_p2 = scmp.eq.s32.totalorder %s2044_s25, 0  ;;  %s1955_s27 = smov [#allocation2]  }
   0x5   : > { %p2049_p3 = pnand %p1787_p0, %p312_p1  ;;  %s331_s28 = sshll.u32 %s1955_s27, 4  ;;  %s332_s28 = int_to_ptr.vmem [resolvable:$true] %s331_s28 }
   0x6   : > { %s358_s13 = sshll.u32 %s2483_s9, 4  ;;  %s1956_s14 = smov [#allocation4]   ;;  %s359_s13 = int_to_ptr.hbm [resolvable:$true] %s358_s13 }
   0x7   : > { %p1826_p4 = pneg %p2049_p3  ;;  %s360_s15 = sshll.u32 %s1956_s14, 4  ;;  %s361_s15 = int_to_ptr.vmem [resolvable:$true] %s360_s15 }
   0x8   : > { %s1957_s16 = smov 512   ;;  %s1958_s17 = smov 32  }
   0x9   : > { %p1827_p5 = pnand %p1833_p2, %p1826_p4  ;;  %s1959_s18 = smov 256  }
   0xa   : > { %s1960_s19 = smov 16   ;;  %390 = sbr.rel (%p2049_p3) target bundleno = 1330 (0x532), region = 68 }
   0xb   : > { %1829 = dma.hbm_to_vmem [thread:$0]  (!%p1827_p5), %s330_s24, 16384, %s332_s28, [#allocation3], %s1957_s16, %s1957_s16, %s1958_s17  }
   0xc   : > { %1832 = dma.hbm_to_vmem [thread:$0]  (!%p1827_p5), %s359_s13, 16384, %s361_s15, [#allocation5], %s1959_s18, %s1959_s18, %s1960_s19  }
   0xf   : > { %1944 = dma.done.wait (%p1833_p2), [#allocation3], 16384  }
  0x10   : > { %1946 = vsyncadd (%p1833_p2), [#allocation3], 4294950912 }
  0x11   : > { %1948 = dma.done.wait (%p1833_p2), [#allocation5], 16384  }
  0x12   : > { %1950 = vsyncadd (%p1833_p2), [#allocation5], 4294950912  ;;  %p438_p6 = scmp.lt.s32.totalorder %s2044_s25, 1  ;;  %v1961_v0 = vmov 0   ;;  %v459_v2 = vld [vmem:[%s2476_s2] sm:$0xf] }
  0x13   : > { %1860 = vset.pattern.permute.xlu0 %v1961_v0  ;;  %1861 = vset.pattern.permute.xlu2 %v1961_v0  ;;  %v578_v3 = vld [vmem:[#allocation2 + $0x1e0] sm:$0xff]  ;;  %vm2488_vm0 = vcmask 1043456   ;;  %v458_v11 = vld [vmem:[%s2475_s1] sm:$0xf]  ;;  %vm2487_vm1 = vcmask 31744   ;;  %v579_v12 = vld [vmem:[#allocation2 + $0x1e8] sm:$0xff] }
  0x14   : > { %s2503_s25 = smov (!%p438_p6, %s2044_s25), 1  ;;  %1862 = vset.pattern.permute.xlu1 %v1961_v0  ;;  %462 = vperm.xlu0 %1860, %v459_v2   ;;  %v642_v4 = vld [vmem:[#allocation2 + $0x3e0] sm:$0xff]  ;;  %v643_v13 = vld [vmem:[#allocation2 + $0x3e8] sm:$0xff]  ;;  %v580_v0 = vld [vmem:[#allocation2 + $0x1f0] sm:$0xff]  ;;  %s1962_s30 = smov 120   ;;  %vm929_vm2 = vcmask 973824  }
  0x15   : > { %s1816_s20 = sshll.u32 %s2503_s25, 3  ;;  %646 = vmatpush.msra.mxu2 %v578_v3  ;;  %666 = vmatpush.msra.mxu3 %v642_v4  ;;  %v574_v5 = vld [vmem:[#allocation2 + $0x1c0] sm:$0xff]  ;;  %v575_v18 = vld [vmem:[#allocation2 + $0x1c8] sm:$0xff]  ;;  %v576_v4 = vld [vmem:[#allocation2 + $0x1d0] sm:$0xff]  ;;  %s1963_s13 = smov 119   ;;  %vm946_vm3 = vcmask 965632  }
  0x16   : > { %s442_s24 = scalar_lea.vmem %s2474_s0, %s1816_s20  ;;  %v638_v6 = vld [vmem:[#allocation2 + $0x3c0] sm:$0xff]  ;;  %v639_v19 = vld [vmem:[#allocation2 + $0x3c8] sm:$0xff]  ;;  %s1964_s14 = smov 118   ;;  %vm912_vm4 = vcmask 982016   ;;  %vm895_vm5 = vcmask 1039360   ;;  %vm855_vm6 = vcmask 64512  }
  0x17   : > { %v448_v1 = vld [vmem:[%s442_s24] sm:$0xff]  ;;  %v570_v7 = vld [vmem:[#allocation2 + $0x1a0] sm:$0xff]  ;;  %647 = vmatpush.msra.mxu2 %v574_v5  ;;  %667 = vmatpush.msra.mxu3 %v638_v6  ;;  %v571_v22 = vld [vmem:[#allocation2 + $0x1a8] sm:$0xff]  ;;  %s1965_s15 = smov 1   ;;  %s1966_s16 = smov 127   ;;  %vm872_vm7 = vcmask 7168  }
  0x18   : > { %466 = vst [vmem:[#allocation1] ss:$2 sm:$0xff] %v448_v1  ;;  %v634_v8 = vld [vmem:[#allocation2 + $0x3a0] sm:$0xff]  ;;  %v635_v23 = vld [vmem:[#allocation2 + $0x3a8] sm:$0xff]  ;;  %v644_v1 = vld [vmem:[#allocation2 + $0x3f0] sm:$0xff]  ;;  %s1967_s17 = smov 9   ;;  %s447_s26 = scalar_lea.vmem %s2486_s12, %s1816_s20 }
  0x19   : > { %v566_v9 = vld [vmem:[#allocation2 + $0x180] sm:$0xff]  ;;  %648 = vmatpush.msra.mxu2 %v570_v7  ;;  %668 = vmatpush.msra.mxu3 %v634_v8  ;;  %v567_v26 = vld [vmem:[#allocation2 + $0x188] sm:$0xff]  ;;  %v640_v5 = vld [vmem:[#allocation2 + $0x3d0] sm:$0xff]  ;;  %s1968_s18 = smov 8   ;;  %s1969_s19 = smov 10   ;;  %vm838_vm8 = vcmask 72704  }
  0x1a   : > { %v630_v10 = vld [vmem:[#allocation2 + $0x380] sm:$0xff]  ;;  %v631_v27 = vld [vmem:[#allocation2 + $0x388] sm:$0xff]  ;;  %v572_v8 = vld [vmem:[#allocation2 + $0x1b0] sm:$0xff]  ;;  %vm821_vm9 = vcmask 80896   ;;  %vm2489_vm10 = vcmask 588800  }
  0x1b   : > { %649 = vmatpush.msra.mxu2 %v566_v9  ;;  %669 = vmatpush.msra.mxu3 %v630_v10  ;;  %v562_v16 = vld [vmem:[#allocation2 + $0x160] sm:$0xff]  ;;  %v563_v30 = vld [vmem:[#allocation2 + $0x168] sm:$0xff]  ;;  %v636_v9 = vld [vmem:[#allocation2 + $0x3b0] sm:$0xff] }
  0x1c   : > { %v626_v17 = vld [vmem:[#allocation2 + $0x360] sm:$0xff]  ;;  %v627_v31 = vld [vmem:[#allocation2 + $0x368] sm:$0xff] }
  0x1d   : > { %v558_v20 = vld [vmem:[#allocation2 + $0x140] sm:$0xff]  ;;  %650 = vmatpush.msra.mxu2 %v562_v16  ;;  %670 = vmatpush.msra.mxu3 %v626_v17  ;;  %v559_v34 = vld [vmem:[#allocation2 + $0x148] sm:$0xff]  ;;  %v577_v16 = vld [vmem:[#allocation2 + $0x1d8] sm:$0xff] }
  0x1e   : > { %v622_v21 = vld [vmem:[#allocation2 + $0x340] sm:$0xff]  ;;  %v623_v35 = vld [vmem:[#allocation2 + $0x348] sm:$0xff]  ;;  %v641_v17 = vld [vmem:[#allocation2 + $0x3d8] sm:$0xff] }
  0x1f   : > { %v467_v14 = vld.sshfl [vmem:[#allocation1] sm:$0xff pattern:$0x75316420]  ;;  %v468_v15 = vld.sshfl [vmem:[#allocation1 + $0x8] sm:$0xff pattern:$0x75316420]  ;;  %651 = vmatpush.msra.mxu2 %v558_v20  ;;  %671 = vmatpush.msra.mxu3 %v622_v21 }
  0x20   : > { %1798 = vmatpush.msk.msra.mxu0 %vm2488_vm0, %v467_v14  ;;  %1800 = vmatpush.msk.msra.mxu1 %vm2488_vm0, %v468_v15  ;;  %v554_v24 = vld [vmem:[#allocation2 + $0x120] sm:$0xff]  ;;  %v555_v38 = vld [vmem:[#allocation2 + $0x128] sm:$0xff]  ;;  %v568_v14 = vld [vmem:[#allocation2 + $0x190] sm:$0xff] }
  0x21   : > { %1799 = vmatmul.msk.f32.vlgmr.msra.gmra.mxu0 %vm2487_vm1, %v458_v11  ;;  %1801 = vmatmul.msk.f32.vlgmr.msra.gmra.mxu1 %vm2487_vm1, %v458_v11  ;;  %v618_v25 = vld [vmem:[#allocation2 + $0x320] sm:$0xff]  ;;  %v619_v39 = vld [vmem:[#allocation2 + $0x328] sm:$0xff]  ;;  %v632_v15 = vld [vmem:[#allocation2 + $0x390] sm:$0xff] }
  0x22   : > { %686 = vmatpush.msrb.mxu0 %v579_v12  ;;  %706 = vmatpush.msrb.mxu1 %v643_v13  ;;  %v550_v28 = vld [vmem:[#allocation2 + $0x100] sm:$0xff]  ;;  %v551_v42 = vld [vmem:[#allocation2 + $0x108] sm:$0xff]  ;;  %v581_v12 = vld [vmem:[#allocation2 + $0x1f8] sm:$0xff] }
  0x23   : > { %v614_v29 = vld [vmem:[#allocation2 + $0x300] sm:$0xff]  ;;  %652 = vmatpush.msra.mxu2 %v554_v24  ;;  %672 = vmatpush.msra.mxu3 %v618_v25  ;;  %v615_v43 = vld [vmem:[#allocation2 + $0x308] sm:$0xff]  ;;  %v645_v13 = vld [vmem:[#allocation2 + $0x3f8] sm:$0xff] }
  0x24   : > { %687 = vmatpush.msrb.mxu0 %v575_v18  ;;  %707 = vmatpush.msrb.mxu1 %v639_v19  ;;  %v546_v32 = vld [vmem:[#allocation2 + $0xe0] sm:$0xff]  ;;  %v547_v46 = vld [vmem:[#allocation2 + $0xe8] sm:$0xff]  ;;  %v564_v18 = vld [vmem:[#allocation2 + $0x170] sm:$0xff] }
  0x25   : > { %v610_v33 = vld [vmem:[#allocation2 + $0x2e0] sm:$0xff]  ;;  %653 = vmatpush.msra.mxu2 %v550_v28  ;;  %673 = vmatpush.msra.mxu3 %v614_v29  ;;  %v611_v47 = vld [vmem:[#allocation2 + $0x2e8] sm:$0xff]  ;;  %v628_v19 = vld [vmem:[#allocation2 + $0x370] sm:$0xff] }
  0x26   : > { %688 = vmatpush.msrb.mxu0 %v571_v22  ;;  %708 = vmatpush.msrb.mxu1 %v635_v23  ;;  %v542_v36 = vld [vmem:[#allocation2 + $0xc0] sm:$0xff]  ;;  %v543_v50 = vld [vmem:[#allocation2 + $0xc8] sm:$0xff]  ;;  %v573_v20 = vld [vmem:[#allocation2 + $0x1b8] sm:$0xff] }
  0x27   : > { %v606_v37 = vld [vmem:[#allocation2 + $0x2c0] sm:$0xff]  ;;  %654 = vmatpush.msra.mxu2 %v546_v32  ;;  %674 = vmatpush.msra.mxu3 %v610_v33  ;;  %v607_v51 = vld [vmem:[#allocation2 + $0x2c8] sm:$0xff]  ;;  %v637_v21 = vld [vmem:[#allocation2 + $0x3b8] sm:$0xff] }
  0x28   : > { %689 = vmatpush.msrb.mxu0 %v567_v26  ;;  %709 = vmatpush.msrb.mxu1 %v631_v27  ;;  %v538_v40 = vld [vmem:[#allocation2 + $0xa0] sm:$0xff]  ;;  %v539_v54 = vld [vmem:[#allocation2 + $0xa8] sm:$0xff]  ;;  %v560_v22 = vld [vmem:[#allocation2 + $0x150] sm:$0xff] }
  0x29   : > { %v602_v41 = vld [vmem:[#allocation2 + $0x2a0] sm:$0xff]  ;;  %655 = vmatpush.msra.mxu2 %v542_v36  ;;  %675 = vmatpush.msra.mxu3 %v606_v37  ;;  %v603_v55 = vld [vmem:[#allocation2 + $0x2a8] sm:$0xff]  ;;  %v624_v23 = vld [vmem:[#allocation2 + $0x350] sm:$0xff] }
  0x2a   : > { %690 = vmatpush.msrb.mxu0 %v563_v30  ;;  %710 = vmatpush.msrb.mxu1 %v627_v31  ;;  %v534_v44 = vld [vmem:[#allocation2 + $0x80] sm:$0xff]  ;;  %v535_v58 = vld [vmem:[#allocation2 + $0x88] sm:$0xff]  ;;  %v569_v24 = vld [vmem:[#allocation2 + $0x198] sm:$0xff] }
  0x2b   : > { %v598_v45 = vld [vmem:[#allocation2 + $0x280] sm:$0xff]  ;;  %656 = vmatpush.msra.mxu2 %v538_v40  ;;  %676 = vmatpush.msra.mxu3 %v602_v41  ;;  %v599_v59 = vld [vmem:[#allocation2 + $0x288] sm:$0xff]  ;;  %v633_v25 = vld [vmem:[#allocation2 + $0x398] sm:$0xff] }
  0x2c   : > { %691 = vmatpush.msrb.mxu0 %v559_v34  ;;  %711 = vmatpush.msrb.mxu1 %v623_v35  ;;  %v530_v48 = vld [vmem:[#allocation2 + $0x60] sm:$0xff]  ;;  %v531_v62 = vld [vmem:[#allocation2 + $0x68] sm:$0xff]  ;;  %v556_v26 = vld [vmem:[#allocation2 + $0x130] sm:$0xff] }
  0x2d   : > { %v594_v49 = vld [vmem:[#allocation2 + $0x260] sm:$0xff]  ;;  %657 = vmatpush.msra.mxu2 %v534_v44  ;;  %677 = vmatpush.msra.mxu3 %v598_v45  ;;  %v595_v63 = vld [vmem:[#allocation2 + $0x268] sm:$0xff]  ;;  %v620_v27 = vld [vmem:[#allocation2 + $0x330] sm:$0xff] }
  0x2e   : > { %692 = vmatpush.msrb.mxu0 %v555_v38  ;;  %712 = vmatpush.msrb.mxu1 %v619_v39  ;;  %v526_v52 = vld [vmem:[#allocation2 + $0x40] sm:$0xff]  ;;  %v527_v2 = vld [vmem:[#allocation2 + $0x48] sm:$0xff]  ;;  %v565_v28 = vld [vmem:[#allocation2 + $0x178] sm:$0xff] }
  0x2f   : > { %v590_v53 = vld [vmem:[#allocation2 + $0x240] sm:$0xff]  ;;  %658 = vmatpush.msra.mxu2 %v530_v48  ;;  %678 = vmatpush.msra.mxu3 %v594_v49  ;;  %v591_v3 = vld [vmem:[#allocation2 + $0x248] sm:$0xff]  ;;  %v629_v29 = vld [vmem:[#allocation2 + $0x378] sm:$0xff] }
  0x30   : > { %693 = vmatpush.msrb.mxu0 %v551_v42  ;;  %713 = vmatpush.msrb.mxu1 %v615_v43  ;;  %v522_v56 = vld [vmem:[#allocation2 + $0x20] sm:$0xff]  ;;  %v523_v6 = vld [vmem:[#allocation2 + $0x28] sm:$0xff]  ;;  %v552_v30 = vld [vmem:[#allocation2 + $0x110] sm:$0xff] }
  0x31   : > { %v586_v57 = vld [vmem:[#allocation2 + $0x220] sm:$0xff]  ;;  %659 = vmatpush.msra.mxu2 %v526_v52  ;;  %679 = vmatpush.msra.mxu3 %v590_v53  ;;  %v587_v7 = vld [vmem:[#allocation2 + $0x228] sm:$0xff]  ;;  %v616_v31 = vld [vmem:[#allocation2 + $0x310] sm:$0xff] }
  0x32   : > { %694 = vmatpush.msrb.mxu0 %v547_v46  ;;  %714 = vmatpush.msrb.mxu1 %v611_v47  ;;  %v518_v60 = vld [vmem:[#allocation2] sm:$0xff]  ;;  %v519_v10 = vld [vmem:[#allocation2 + $0x8] sm:$0xff]  ;;  %v561_v32 = vld [vmem:[#allocation2 + $0x158] sm:$0xff] }
  0x33   : > { %v582_v61 = vld [vmem:[#allocation2 + $0x200] sm:$0xff]  ;;  %660 = vmatpush.msra.mxu2 %v522_v56  ;;  %680 = vmatpush.msra.mxu3 %v586_v57  ;;  %v583_v11 = vld [vmem:[#allocation2 + $0x208] sm:$0xff]  ;;  %v625_v33 = vld [vmem:[#allocation2 + $0x358] sm:$0xff] }
  0x34   : > { %695 = vmatpush.msrb.mxu0 %v543_v50  ;;  %715 = vmatpush.msrb.mxu1 %v607_v51  ;;  %v548_v34 = vld [vmem:[#allocation2 + $0xf0] sm:$0xff]  ;;  %v557_v36 = vld [vmem:[#allocation2 + $0x138] sm:$0xff] }
  0x35   : > { %661 = vmatpush.msra.mxu2 %v518_v60  ;;  %681 = vmatpush.msra.mxu3 %v582_v61  ;;  %v612_v35 = vld [vmem:[#allocation2 + $0x2f0] sm:$0xff]  ;;  %v621_v37 = vld [vmem:[#allocation2 + $0x338] sm:$0xff] }
  0x36   : > { %696 = vmatpush.msrb.mxu0 %v539_v54  ;;  %716 = vmatpush.msrb.mxu1 %v603_v55  ;;  %v544_v38 = vld [vmem:[#allocation2 + $0xd0] sm:$0xff]  ;;  %v553_v40 = vld [vmem:[#allocation2 + $0x118] sm:$0xff] }
  0x37   : > { %726 = vmatpush.msrb.mxu2 %v580_v0  ;;  %746 = vmatpush.msrb.mxu3 %v644_v1  ;;  %v608_v39 = vld [vmem:[#allocation2 + $0x2d0] sm:$0xff]  ;;  %v617_v41 = vld [vmem:[#allocation2 + $0x318] sm:$0xff] }
  0x38   : > { %697 = vmatpush.msrb.mxu0 %v535_v58  ;;  %717 = vmatpush.msrb.mxu1 %v599_v59  ;;  %v540_v42 = vld [vmem:[#allocation2 + $0xb0] sm:$0xff]  ;;  %v549_v44 = vld [vmem:[#allocation2 + $0xf8] sm:$0xff] }
  0x39   : > { %727 = vmatpush.msrb.mxu2 %v576_v4  ;;  %747 = vmatpush.msrb.mxu3 %v640_v5  ;;  %v604_v43 = vld [vmem:[#allocation2 + $0x2b0] sm:$0xff]  ;;  %v613_v45 = vld [vmem:[#allocation2 + $0x2f8] sm:$0xff] }
  0x3a   : > { %698 = vmatpush.msrb.mxu0 %v531_v62  ;;  %718 = vmatpush.msrb.mxu1 %v595_v63  ;;  %v545_v46 = vld [vmem:[#allocation2 + $0xd8] sm:$0xff]  ;;  %v536_v50 = vld [vmem:[#allocation2 + $0x90] sm:$0xff] }
  0x3b   : > { %728 = vmatpush.msrb.mxu2 %v572_v8  ;;  %748 = vmatpush.msrb.mxu3 %v636_v9  ;;  %v609_v47 = vld [vmem:[#allocation2 + $0x2d8] sm:$0xff]  ;;  %v600_v51 = vld [vmem:[#allocation2 + $0x290] sm:$0xff] }
  0x3c   : > { %699 = vmatpush.msrb.mxu0 %v527_v2  ;;  %719 = vmatpush.msrb.mxu1 %v591_v3  ;;  %v541_v48 = vld [vmem:[#allocation2 + $0xb8] sm:$0xff]  ;;  %v532_v54 = vld [vmem:[#allocation2 + $0x70] sm:$0xff] }
  0x3d   : > { %729 = vmatpush.msrb.mxu2 %v568_v14  ;;  %749 = vmatpush.msrb.mxu3 %v632_v15  ;;  %v605_v49 = vld [vmem:[#allocation2 + $0x2b8] sm:$0xff]  ;;  %v596_v55 = vld [vmem:[#allocation2 + $0x270] sm:$0xff] }
  0x3e   : > { %700 = vmatpush.msrb.mxu0 %v523_v6  ;;  %720 = vmatpush.msrb.mxu1 %v587_v7  ;;  %v537_v52 = vld [vmem:[#allocation2 + $0x98] sm:$0xff]  ;;  %v528_v58 = vld [vmem:[#allocation2 + $0x50] sm:$0xff] }
  0x3f   : > { %730 = vmatpush.msrb.mxu2 %v564_v18  ;;  %750 = vmatpush.msrb.mxu3 %v628_v19  ;;  %v601_v53 = vld [vmem:[#allocation2 + $0x298] sm:$0xff]  ;;  %v592_v59 = vld [vmem:[#allocation2 + $0x250] sm:$0xff] }
  0x40   : > { %701 = vmatpush.msrb.mxu0 %v519_v10  ;;  %721 = vmatpush.msrb.mxu1 %v583_v11  ;;  %v533_v56 = vld [vmem:[#allocation2 + $0x78] sm:$0xff]  ;;  %v524_v62 = vld [vmem:[#allocation2 + $0x30] sm:$0xff] }
  0x41   : > { %731 = vmatpush.msrb.mxu2 %v560_v22  ;;  %751 = vmatpush.msrb.mxu3 %v624_v23  ;;  %v597_v57 = vld [vmem:[#allocation2 + $0x278] sm:$0xff]  ;;  %v588_v63 = vld [vmem:[#allocation2 + $0x230] sm:$0xff] }
  0x42   : > { %766 = vmatpush.msra.mxu0 %v581_v12  ;;  %786 = vmatpush.msra.mxu1 %v645_v13  ;;  %v529_v60 = vld [vmem:[#allocation2 + $0x58] sm:$0xff]  ;;  %v520_v2 = vld [vmem:[#allocation2 + $0x10] sm:$0xff] }
  0x43   : > { %732 = vmatpush.msrb.mxu2 %v556_v26  ;;  %752 = vmatpush.msrb.mxu3 %v620_v27  ;;  %v593_v61 = vld [vmem:[#allocation2 + $0x258] sm:$0xff]  ;;  %v584_v3 = vld [vmem:[#allocation2 + $0x210] sm:$0xff] }
  0x44   : > { %767 = vmatpush.msra.mxu0 %v577_v16  ;;  %787 = vmatpush.msra.mxu1 %v641_v17  ;;  %v525_v0 = vld [vmem:[#allocation2 + $0x38] sm:$0xff] }
  0x45   : > { %733 = vmatpush.msrb.mxu2 %v552_v30  ;;  %753 = vmatpush.msrb.mxu3 %v616_v31  ;;  %v589_v1 = vld [vmem:[#allocation2 + $0x238] sm:$0xff] }
  0x46   : > { %768 = vmatpush.msra.mxu0 %v573_v20  ;;  %788 = vmatpush.msra.mxu1 %v637_v21  ;;  %v521_v4 = vld [vmem:[#allocation2 + $0x18] sm:$0xff] }
  0x47   : > { %734 = vmatpush.msrb.mxu2 %v548_v34  ;;  %754 = vmatpush.msrb.mxu3 %v612_v35  ;;  %v585_v5 = vld [vmem:[#allocation2 + $0x218] sm:$0xff]  ;;  %v2138_v34 = vld [vmem:[%s2478_s4 + $0xe] sm:$0x3] }
  0x48   : > { %769 = vmatpush.msra.mxu0 %v569_v24  ;;  %789 = vmatpush.msra.mxu1 %v633_v25 }
  0x49   : > { %735 = vmatpush.msrb.mxu2 %v544_v38  ;;  %755 = vmatpush.msrb.mxu3 %v608_v39  ;;  %v2148_v39 = vld [vmem:[%s2478_s4 + $0xc] sm:$0x3] }
  0x4a   : > { %770 = vmatpush.msra.mxu0 %v565_v28  ;;  %790 = vmatpush.msra.mxu1 %v629_v29 }
  0x4b   : > { %736 = vmatpush.msrb.mxu2 %v540_v42  ;;  %756 = vmatpush.msrb.mxu3 %v604_v43 }
  0x4c   : > { %771 = vmatpush.msra.mxu0 %v561_v32  ;;  %791 = vmatpush.msra.mxu1 %v625_v33  ;;  %v2133_v33 = vld [vmem:[%s2478_s4 + $0x10] sm:$0x3] }
  0x4d   : > { %737 = vmatpush.msrb.mxu2 %v536_v50  ;;  %757 = vmatpush.msrb.mxu3 %v600_v51  ;;  %v953_v35 = vperm.slane %v2133_v33, 0 }
  0x4e   : > { %772 = vmatpush.msra.mxu0 %v557_v36  ;;  %792 = vmatpush.msra.mxu1 %v621_v37  ;;  %v954_v36 = vperm.slane %v2133_v33, 1  ;;  %v960_v37 = vld [vmem:[%s2480_s6] sm:$0xff] }
  0x4f   : > { %738 = vmatpush.msrb.mxu2 %v532_v54  ;;  %758 = vmatpush.msrb.mxu3 %v596_v55 }
  0x50   : > { %773 = vmatpush.msra.mxu0 %v553_v40  ;;  %793 = vmatpush.msra.mxu1 %v617_v41  ;;  %v936_v40 = vperm.slane %v2138_v34, 0  ;;  %v937_v41 = vperm.slane %v2138_v34, 1 }
  0x51   : > { %739 = vmatpush.msrb.mxu2 %v528_v58  ;;  %759 = vmatpush.msrb.mxu3 %v592_v59  ;;  %v2180_v59 = vld [vmem:[%s2478_s4 + $0x8] sm:$0x3] }
  0x52   : > { %774 = vmatpush.msra.mxu0 %v549_v44  ;;  %794 = vmatpush.msra.mxu1 %v613_v45 }
  0x53   : > { %740 = vmatpush.msrb.mxu2 %v524_v62  ;;  %760 = vmatpush.msrb.mxu3 %v588_v63 }
  0x54   : > { %775 = vmatpush.msra.mxu0 %v545_v46  ;;  %795 = vmatpush.msra.mxu1 %v609_v47 }
  0x55   : > { %741 = vmatpush.msrb.mxu2 %v520_v2  ;;  %761 = vmatpush.msrb.mxu3 %v584_v3 }
  0x56   : > { %776 = vmatpush.msra.mxu0 %v541_v48  ;;  %796 = vmatpush.msra.mxu1 %v605_v49  ;;  %v919_v48 = vperm.slane %v2148_v39, 0  ;;  %v920_v49 = vperm.slane %v2148_v39, 1 }
  0x58   : > { %777 = vmatpush.msra.mxu0 %v537_v52  ;;  %797 = vmatpush.msra.mxu1 %v601_v53 }
  0x5a   : > { %778 = vmatpush.msra.mxu0 %v533_v56  ;;  %798 = vmatpush.msra.mxu1 %v597_v57  ;;  %v2171_v56 = vld [vmem:[%s2478_s4 + $0xa] sm:$0x3] }
  0x5c   : > { %779 = vmatpush.msra.mxu0 %v529_v60  ;;  %799 = vmatpush.msra.mxu1 %v593_v61  ;;  %v902_v60 = vperm.slane %v2171_v56, 0  ;;  %v903_v61 = vperm.slane %v2171_v56, 1 }
  0x5e   : > { %780 = vmatpush.msra.mxu0 %v525_v0  ;;  %800 = vmatpush.msra.mxu1 %v589_v1  ;;  %v885_v0 = vperm.slane %v2180_v59, 0  ;;  %v886_v1 = vperm.slane %v2180_v59, 1 }
  0x60   : > { %781 = vmatpush.msra.mxu0 %v521_v4  ;;  %801 = vmatpush.msra.mxu1 %v585_v5 }
  0x86   : > { %v463_v6 = vpop.permute.xlu0 %462 }
  0x9e   : > { %v495_v7 = vpop.f32.mrf.mxu0  ;;  %v515_v8 = vpop.f32.mrf.mxu1 }
  0x9f   : > { %v496_v9 = vadd.f32 %v495_v7, %v463_v6  ;;  %v516_v10 = vadd.f32 %v515_v8, %v463_v6  ;;  %v2195_v6 = vld [vmem:[%s2478_s4 + $0x6] sm:$0x3] }
  0xa1   : > { %662 = vmatmul.f32.vlgmr.msra.gmra.mxu2 %v496_v9  ;;  %682 = vmatmul.f32.vlgmr.msra.gmra.mxu3 %v516_v10 }
  0xa2   : > { %702 = vmatmul.f32.vlgmr.msrb.gmra.mxu0 %v496_v9  ;;  %722 = vmatmul.f32.vlgmr.msrb.gmra.mxu1 %v516_v10 }
  0xa9   : > { %742 = vmatmul.f32.vlgmr.msrb.gmra.mxu2 %v496_v9  ;;  %762 = vmatmul.f32.vlgmr.msrb.gmra.mxu3 %v516_v10 }
  0xaa   : > { %782 = vmatmul.f32.vlgmr.msra.gmra.mxu0 %v496_v9  ;;  %802 = vmatmul.f32.vlgmr.msra.gmra.mxu1 %v516_v10  ;;  %v2206_v9 = vld [vmem:[%s2478_s4 + $0x4] sm:$0x3] }
 0x11f   : > { %v703_v11 = vpop.f32.mrf.mxu0  ;;  %v723_v12 = vpop.f32.mrf.mxu1 }
 0x120   : > { %v724_v18 = vadd.f32 %v723_v12, %v703_v11  ;;  %v878_v11 = vperm.slane %v2195_v6, 0  ;;  %v879_v12 = vperm.slane %v2195_v6, 1 }
 0x124   : > { %v663_v13 = vpop.f32.mrf.mxu2  ;;  %v683_v14 = vpop.f32.mrf.mxu3 }
 0x125   : > { %v684_v25 = vadd.f32 %v683_v14, %v663_v13  ;;  %v2213_v13 = vld [vmem:[%s2478_s4 + $0x2] sm:$0x3]  ;;  %v861_v14 = vperm.slane %v2206_v9, 0 }
 0x127   : > { %v783_v15 = vpop.f32.mrf.mxu0  ;;  %v803_v16 = vpop.f32.mrf.mxu1 }
 0x128   : > { %v804_v17 = vadd.f32 %v803_v16, %v783_v15  ;;  %v862_v15 = vperm.slane %v2206_v9, 1 }
 0x12a   : > { %v809_v19 = vrot.slane %v804_v17, 4 }
 0x12c   : > { %v2091_v20 = vsel %vm2488_vm0, %v724_v18, %v809_v19  ;;  %v763_v21 = vpop.f32.mrf.mxu3  ;;  %v743_v22 = vpop.f32.mrf.mxu2 }
 0x12d   : > { %910 = vrot.lane.b32.xlu0 %v2091_v20, %s1962_s30  ;;  %927 = vrot.lane.b32.xlu2 %v2091_v20, %s1963_s13  ;;  %v764_v23 = vadd.f32 %v763_v21, %v743_v22  ;;  %v890_v8 = vmul.f32 %v886_v1, %v2091_v20  ;;  %v844_v22 = vperm.slane %v2213_v13, 0 }
 0x12e   : > { %944 = vrot.lane.b32.xlu1 %v2091_v20, %s1964_s14 }
 0x12f   : > { %v808_v24 = vrot.slane %v764_v23, 4  ;;  %v845_v23 = vperm.slane %v2213_v13, 1 }
 0x131   : > { %v2100_v26 = vsel %vm2488_vm0, %v684_v25, %v808_v24 }
 0x132   : > { %v889_v7 = vmul.f32 %v885_v0, %v2100_v26 }
 0x135   : > { %867 = vrot.lane.b32.xlu0 %v2091_v20, %s1965_s15  ;;  %893 = vrot.lane.b32.xlu2 %v2091_v20, %s1966_s16 }
 0x136   : > { %925 = vrot.lane.b32.xlu1 %v2100_v26, %s1963_s13 }
 0x13d   : > { %908 = vrot.lane.b32.xlu2 %v2100_v26, %s1962_s30  ;;  %942 = vrot.lane.b32.xlu0 %v2100_v26, %s1964_s14 }
 0x13e   : > { %833 = vrot.lane.b32.xlu1 %v2091_v20, %s1967_s17 }
 0x145   : > { %850 = vrot.lane.b32.xlu2 %v2091_v20, %s1968_s18  ;;  %853 = vrot.lane.b32.xlu0 %v2100_v26, %s1968_s18 }
 0x146   : > { %891 = vrot.lane.b32.xlu1 %v2100_v26, %s1966_s16 }
 0x14d   : > { %836 = vrot.lane.b32.xlu2 %v2100_v26, %s1967_s17  ;;  %815 = vrot.lane.b32.xlu0 %v2091_v20, %s1969_s19 }
 0x14e   : > { %870 = vrot.lane.b32.xlu1 %v2100_v26, %s1965_s15 }
 0x155   : > { %963 = vperm.xlu2 %1861, %v960_v37  }
 0x156   : > { %819 = vrot.lane.b32.xlu1 %v2100_v26, %s1969_s19 }
 0x187   : > { %v928_v27 = vpop.permute.xlu2 %927 }
 0x18f   : > { %v894_v30 = vpop.permute.xlu2 %893 }
 0x197   : > { %v909_v38 = vpop.permute.xlu2 %908 }
 0x19f   : > { %v911_v28 = vpop.permute.xlu0 %910  ;;  %v851_v62 = vpop.permute.xlu2 %850 }
 0x1a0   : > { %v945_v29 = vpop.permute.xlu1 %944  ;;  %v913_v52 = vsel %vm912_vm4, %v909_v38, %v911_v28  ;;  %v917_v53 = vsel %vm912_vm4, %v911_v28, %v909_v38  ;;  %v2234_v28 = vld [vmem:[%s2478_s4] sm:$0x3] }
 0x1a1   : > { %v923_v57 = vmul.f32 %v919_v48, %v913_v52  ;;  %v924_v58 = vmul.f32 %v920_v49, %v917_v53  ;;  %v827_v37 = vperm.slane %v2234_v28, 0  ;;  %v828_v38 = vperm.slane %v2234_v28, 1  ;;  %v1418_v28 = vld [vmem:[#allocation4 + $0x1e0] sm:$0xff] }
 0x1a7   : > { %v2128_v31 = vpop.permute.xlu0 %867  ;;  %v837_v21 = vpop.permute.xlu2 %836 }
 0x1a8   : > { %v926_v32 = vpop.permute.xlu1 %925 }
 0x1a9   : > { %v930_v43 = vsel %vm929_vm2, %v926_v32, %v928_v27  ;;  %v934_v44 = vsel %vm929_vm2, %v928_v27, %v926_v32 }
 0x1aa   : > { %v940_v54 = vmul.f32 %v936_v40, %v930_v43  ;;  %v941_v55 = vmul.f32 %v937_v41, %v934_v44 }
 0x1af   : > { %v943_v42 = vpop.permute.xlu0 %942 }
 0x1b0   : > { %v834_v45 = vpop.permute.xlu1 %833  ;;  %v947_v46 = vsel %vm946_vm3, %v943_v42, %v945_v29  ;;  %v951_v47 = vsel %vm946_vm3, %v945_v29, %v943_v42 }
 0x1b1   : > { %v957_v50 = vmul.f32 %v953_v35, %v947_v46  ;;  %v958_v51 = vmul.f32 %v954_v36, %v951_v47  ;;  %v839_v26 = vsel %vm838_vm8, %v837_v21, %v834_v45  ;;  %v842_v27 = vsel %vm838_vm8, %v834_v45, %v837_v21 }
 0x1b2   : > { %v849_v32 = vmul.f32 %v845_v23, %v839_v26 }
 0x1b3   : > { %977 = vmatpush.msra.mxu2 %v957_v50  ;;  %997 = vmatpush.msra.mxu3 %v958_v51  ;;  %v959_v50 = vld [vmem:[%s2479_s5] sm:$0xff]  ;;  %v964_v51 = vpop.permute.xlu2 %963 }
 0x1b5   : > { %978 = vmatpush.msra.mxu2 %v940_v54  ;;  %998 = vmatpush.msra.mxu3 %v941_v55 }
 0x1b7   : > { %979 = vmatpush.msra.mxu2 %v923_v57  ;;  %999 = vmatpush.msra.mxu3 %v924_v58  ;;  %v854_v10 = vpop.permute.xlu0 %853 }
 0x1b8   : > { %v892_v63 = vpop.permute.xlu1 %891  ;;  %v856_v17 = vsel %vm855_vm6, %v854_v10, %v851_v62  ;;  %v859_v18 = vsel %vm855_vm6, %v851_v62, %v854_v10 }
 0x1b9   : > { %v896_v2 = vsel %vm895_vm5, %v892_v63, %v894_v30  ;;  %v900_v3 = vsel %vm895_vm5, %v894_v30, %v892_v63  ;;  %v865_v29 = vmul.f32 %v861_v14, %v859_v18  ;;  %v866_v30 = vmul.f32 %v862_v15, %v856_v17 }
 0x1ba   : > { %v906_v4 = vmul.f32 %v902_v60, %v896_v2  ;;  %v907_v5 = vmul.f32 %v903_v61, %v900_v3 }
 0x1bc   : > { %980 = vmatpush.msra.mxu2 %v906_v4  ;;  %1000 = vmatpush.msra.mxu3 %v907_v5 }
 0x1be   : > { %981 = vmatpush.msra.mxu2 %v889_v7  ;;  %1001 = vmatpush.msra.mxu3 %v890_v8 }
 0x1bf   : > { %v816_v42 = vpop.permute.xlu0 %815 }
 0x1c0   : > { %v871_v16 = vpop.permute.xlu1 %870 }
 0x1c1   : > { %v873_v19 = vsel %vm872_vm7, %v871_v16, %v2128_v31  ;;  %v876_v20 = vsel %vm872_vm7, %v2128_v31, %v871_v16  ;;  %v848_v31 = vmul.f32 %v844_v22, %v842_v27 }
 0x1c2   : > { %v882_v24 = vmul.f32 %v878_v11, %v876_v20  ;;  %v883_v25 = vmul.f32 %v879_v12, %v873_v19 }
 0x1c4   : > { %982 = vmatpush.msra.mxu2 %v882_v24  ;;  %1002 = vmatpush.msra.mxu3 %v883_v25 }
 0x1c6   : > { %983 = vmatpush.msra.mxu2 %v865_v29  ;;  %1003 = vmatpush.msra.mxu3 %v866_v30 }
 0x1c8   : > { %v820_v43 = vpop.permute.xlu1 %819  ;;  %984 = vmatpush.msra.mxu2 %v848_v31  ;;  %1004 = vmatpush.msra.mxu3 %v849_v32 }
 0x1c9   : > { %v822_v44 = vsel %vm821_vm9, %v820_v43, %v816_v42  ;;  %v825_v45 = vsel %vm821_vm9, %v816_v42, %v820_v43 }
 0x1ca   : > { %v831_v46 = vmul.f32 %v827_v37, %v825_v45  ;;  %v832_v47 = vmul.f32 %v828_v38, %v822_v44 }
 0x1cc   : > { %985 = vmatpush.msra.mxu2 %v831_v46  ;;  %1005 = vmatpush.msra.mxu3 %v832_v47 }
 0x1cd   : > { %1802 = vmatmul.msk.f32.vlgmr.msra.gmra.mxu2 %vm2489_vm10, %v959_v50  ;;  %1803 = vmatmul.msk.f32.vlgmr.msra.gmra.mxu3 %vm2489_vm10, %v959_v50 }
 0x250   : > { %v987_v52 = vpop.f32.mrf.mxu2  ;;  %v1007_v53 = vpop.f32.mrf.mxu3 }
 0x251   : > { %v2257_v54 = vadd.f32 %v987_v52, %v964_v51  ;;  %v2259_v55 = vadd.f32 %v1007_v53, %v964_v51 }
 0x253   : > { %v2262_v57 = vmul.f32 0.70710677, %v2257_v54  ;;  %v2265_v58 = vmul.f32 0.70710677, %v2259_v55 }
 0x255   : > { %v2268_v62 = vand.u32 2147483647, %v2262_v57  ;;  %v2271_v63 = vand.u32 2147483647, %v2265_v58 }
 0x257   : > { %v1016_v2 = vmul.f32 0.5, %v2268_v62  ;;  %v1017_v3 = vmul.f32 0.5, %v2271_v63 }
 0x259   : > { %v1018_v4 = vadd.f32 1.0, %v1016_v2  ;;  %v1019_v5 = vadd.f32 1.0, %v1017_v3 }
 0x25b   : > { %1863 = vrcp.f32 %v1018_v4  ;;  %v1031_v18 = vand.u32 2147483648, %v1018_v4  ;;  %v1029_v21 = vand.u32 2147483647, %v1018_v4  ;;  %v1046_v24 = vand.u32 2147483648, %v1019_v5 }
 0x25c   : > { %1865 = vrcp.f32 %v1019_v5  ;;  %v1044_v26 = vand.u32 2147483647, %v1019_v5  ;;  %vm1025_vm13 = vweird.f32 %v1018_v4  ;;  %vm1040_vm15 = vweird.f32 %v1019_v5 }
 0x25d   : > { %v1032_v29 = vor.u32 1.1754944e-38, %v1031_v18  ;;  %vm1030_vm1 = vcmp.eq.f32.partialorder %v1029_v21, 8.507059e+37  ;;  %v1047_v32 = vor.u32 1.1754944e-38, %v1046_v24 }
 0x25e   : > { %vm1045_vm10 = vcmp.eq.f32.partialorder %v1044_v26, 8.507059e+37 }
 0x261   : > { %v1864_v7 = vpop.eup %1863 }
 0x262   : > { %v1866_v8 = vpop.eup %1865  ;;  %v1021_v10 = vmul.f32 %v1864_v7, %v1018_v4  ;;  %vm1026_vm11 = vweird.f32 %v1864_v7 }
 0x263   : > { %v1036_v16 = vmul.f32 %v1866_v8, %v1019_v5  ;;  %vm1041_vm12 = vweird.f32 %v1866_v8  ;;  %vm1027_vm14 = vmor %vm1025_vm13, %vm1026_vm11 }
 0x264   : > { %v1022_v17 = vsub.f32 1.0, %v1021_v10  ;;  %vm1042_vm0 = vmor %vm1040_vm15, %vm1041_vm12  ;;  %vm2498_vm15 = vcmask 31744  }
 0x265   : > { %v1037_v19 = vsub.f32 1.0, %v1036_v16 }
 0x266   : > { %v1023_v20 = vmul.f32 %v1864_v7, %v1022_v17 }
 0x267   : > { %v1038_v25 = vmul.f32 %v1866_v8, %v1037_v19 }
 0x268   : > { %v1024_v27 = vadd.f32 %v1864_v7, %v1023_v20 }
 0x269   : > { %v1039_v30 = vadd.f32 %v1866_v8, %v1038_v25 }
 0x26a   : > { %v1028_v31 = vsel %vm1027_vm14, %v1864_v7, %v1024_v27  ;;  %vm2497_vm14 = vcmask 1043456  }
 0x26b   : > { %v1033_v42 = vsel %vm1030_vm1, %v1032_v29, %v1028_v31  ;;  %v1043_v43 = vsel %vm1042_vm0, %v1866_v8, %v1039_v30  ;;  %vm1098_vm0 = vcmp.ge.f32.partialorder %v2262_v57, 0.0  ;;  %vm1099_vm1 = vcmp.ge.f32.partialorder %v2265_v58, 0.0 }
 0x26c   : > { %v1050_v44 = vmul.f32 0.17087276, %v1033_v42  ;;  %v1048_v45 = vsel %vm1045_vm10, %v1047_v32, %v1043_v43 }
 0x26d   : > { %v1051_v46 = vmul.f32 0.17087276, %v1048_v45 }
 0x26e   : > { %v1052_v47 = vadd.f32 -0.82215226, %v1050_v44 }
 0x26f   : > { %v1053_v50 = vadd.f32 -0.82215226, %v1051_v46 }
 0x270   : > { %v1054_v51 = vmul.f32 %v1052_v47, %v1033_v42  ;;  %v1086_v47 = vsub.f32 0.0, %v2268_v62 }
 0x271   : > { %v1055_v52 = vmul.f32 %v1053_v50, %v1048_v45 }
 0x272   : > { %v1056_v53 = vadd.f32 1.4885159, %v1054_v51  ;;  %v1087_v51 = vsub.f32 0.0, %v2271_v63 }
 0x273   : > { %v1057_v2 = vadd.f32 1.4885159, %v1055_v52 }
 0x274   : > { %v1058_v3 = vmul.f32 %v1056_v53, %v1033_v42 }
 0x275   : > { %v1059_v4 = vmul.f32 %v1057_v2, %v1048_v45 }
 0x276   : > { %v1060_v10 = vadd.f32 -1.135204, %v1058_v3  ;;  %v1088_v3 = vmul.f32 %v1086_v47, %v2268_v62 }
 0x277   : > { %v1061_v5 = vadd.f32 -1.135204, %v1059_v4 }
 0x278   : > { %v1062_v7 = vmul.f32 %v1060_v10, %v1033_v42  ;;  %v1089_v10 = vmul.f32 %v1087_v51, %v2271_v63  ;;  %v1010_v63 = vmul.f32 0.5, %v2257_v54  ;;  %v1647_v54 = vld [vmem:[%s2485_s11] sm:$0xf] }
 0x279   : > { %v1063_v16 = vmul.f32 %v1061_v5, %v1048_v45 }
 0x27a   : > { %v1064_v17 = vadd.f32 0.27886808, %v1062_v7 }
 0x27b   : > { %v1065_v18 = vadd.f32 0.27886808, %v1063_v16 }
 0x27c   : > { %v1066_v19 = vmul.f32 %v1064_v17, %v1033_v42 }
 0x27d   : > { %v1067_v8 = vmul.f32 %v1065_v18, %v1048_v45 }
 0x27e   : > { %v1068_v20 = vadd.f32 -0.18628806, %v1066_v19 }
 0x27f   : > { %v1069_v21 = vadd.f32 -0.18628806, %v1067_v8 }
 0x280   : > { %v1070_v24 = vmul.f32 %v1068_v20, %v1033_v42 }
 0x281   : > { %v1071_v25 = vmul.f32 %v1069_v21, %v1048_v45 }
 0x282   : > { %v1072_v26 = vadd.f32 0.09678418, %v1070_v24 }
 0x283   : > { %v1073_v27 = vadd.f32 0.09678418, %v1071_v25 }
 0x284   : > { %v1074_v29 = vmul.f32 %v1072_v26, %v1033_v42 }
 0x285   : > { %v1075_v30 = vmul.f32 %v1073_v27, %v1048_v45 }
 0x286   : > { %v1076_v31 = vadd.f32 0.37409195, %v1074_v29 }
 0x287   : > { %v1077_v32 = vadd.f32 0.37409195, %v1075_v30  ;;  %v1011_v30 = vmul.f32 0.5, %v2259_v55 }
 0x288   : > { %v1078_v43 = vmul.f32 %v1076_v31, %v1033_v42 }
 0x289   : > { %v1079_v44 = vmul.f32 %v1077_v32, %v1048_v45 }
 0x28a   : > { %v1080_v46 = vadd.f32 1.0000237, %v1078_v43 }
 0x28b   : > { %v1081_v50 = vadd.f32 1.0000237, %v1079_v44 }
 0x28c   : > { %v1082_v52 = vmul.f32 %v1080_v46, %v1033_v42 }
 0x28d   : > { %v1083_v53 = vmul.f32 %v1081_v50, %v1048_v45 }
 0x28e   : > { %v1084_v2 = vadd.f32 -1.2655122, %v1082_v52 }
 0x28f   : > { %v1085_v4 = vadd.f32 -1.2655122, %v1083_v53 }
 0x290   : > { %v1090_v5 = vadd.f32 %v1088_v3, %v1084_v2 }
 0x291   : > { %v1091_v7 = vadd.f32 %v1089_v10, %v1085_v4  ;;  %v1203_v10 = vld [vmem:[%s2482_s8] sm:$0xff] }
 0x292   : > { %v1092_v16 = vmul.f32 1.442695, %v1090_v5 }
 0x293   : > { %v1094_v17 = vmul.f32 1.442695, %v1091_v7 }
 0x294   : > { %1867 = vpow2.f32 %v1092_v16 }
 0x295   : > { %1869 = vpow2.f32 %v1094_v17 }
 0x29a   : > { %v1868_v18 = vpop.eup %1867 }
 0x29b   : > { %v1870_v19 = vpop.eup %1869  ;;  %v1096_v8 = vmul.f32 %v1868_v18, %v1033_v42 }
 0x29c   : > { %v1097_v20 = vmul.f32 %v1870_v19, %v1048_v45 }
 0x29d   : > { %v1100_v21 = vsub.f32 1.0, %v1096_v8  ;;  %v1804_v24 = vadd.f32 -1.0, %v1096_v8 }
 0x29e   : > { %v1101_v25 = vsub.f32 1.0, %v1097_v20  ;;  %v1805_v26 = vadd.f32 -1.0, %v1097_v20 }
 0x29f   : > { %v1104_v62 = vsel %vm1098_vm0, %v1100_v21, %v1804_v24  ;;  %vm2499_vm0 = vmmov %vm2497_vm14 }
 0x2a0   : > { %v1106_v27 = vadd.f32 1.0, %v1104_v62  ;;  %v1105_v29 = vsel %vm1099_vm1, %v1101_v25, %v1805_v26  ;;  %vm2500_vm1 = vmmov %vm2498_vm15 }
 0x2a1   : > { %v1107_v31 = vadd.f32 1.0, %v1105_v29 }
 0x2a2   : > { %v1108_v32 = vmul.f32 %v1106_v27, %v1010_v63  ;;  %v1420_v27 = vld [vmem:[#allocation4 + $0x1f0] sm:$0xff] }
 0x2a3   : > { %v1109_v43 = vmul.f32 %v1107_v31, %v1011_v30  ;;  %1506 = vmatpush.msrb.mxu3 %v1420_v27  ;;  %v1386_v30 = vld [vmem:[#allocation4 + $0xe0] sm:$0xff] }
 0x2a4   : > { %1180 = vrot.lane.b32.xlu2 %v1108_v32, %s1963_s13  ;;  %1191 = vrot.lane.b32.xlu0 %v1108_v32, %s1964_s14 }
 0x2a5   : > { %1193 = vrot.lane.b32.xlu1 %v1109_v43, %s1964_s14  ;;  %v1157_v16 = vmul.f32 %v1109_v43, %v886_v1  ;;  %1507 = vmatpush.msrb.mxu3 %v1418_v28  ;;  %v1396_v28 = vld [vmem:[#allocation4 + $0x130] sm:$0xff] }
 0x2ac   : > { %1171 = vrot.lane.b32.xlu2 %v1109_v43, %s1962_s30  ;;  %1182 = vrot.lane.b32.xlu0 %v1109_v43, %s1963_s13 }
 0x2ad   : > { %1169 = vrot.lane.b32.xlu1 %v1108_v32, %s1962_s30 }
 0x2b4   : > { %1145 = vrot.lane.b32.xlu2 %v1109_v43, %s1965_s15  ;;  %1158 = vrot.lane.b32.xlu0 %v1108_v32, %s1966_s16 }
 0x2b5   : > { %1160 = vrot.lane.b32.xlu1 %v1109_v43, %s1966_s16 }
 0x2bc   : > { %1137 = vrot.lane.b32.xlu2 %v1108_v32, %s1968_s18  ;;  %1148 = vrot.lane.b32.xlu0 %v1108_v32, %s1965_s15 }
 0x2bd   : > { %1134 = vrot.lane.b32.xlu1 %v1109_v43, %s1968_s18 }
 0x2c4   : > { %1111 = vrot.lane.b32.xlu2 %v1109_v43, %s1969_s19  ;;  %1123 = vrot.lane.b32.xlu0 %v1109_v43, %s1967_s17  ;;  %v1484_v43 = vld [vmem:[#allocation4 + $0x3f0] sm:$0xff] }
 0x2c5   : > { %1126 = vrot.lane.b32.xlu1 %v1108_v32, %s1967_s17 }
 0x2cc   : > { %1650 = vperm.xlu2 %1861, %v1647_v54   ;;  %1115 = vrot.lane.b32.xlu0 %v1108_v32, %s1969_s19  ;;  %v1384_v54 = vld [vmem:[#allocation4 + $0xd0] sm:$0xff] }
 0x2cd   : > { %1206 = vperm.xlu1 %1862, %v1203_v10   ;;  %v1410_v10 = vld [vmem:[#allocation4 + $0x1a0] sm:$0xff] }
 0x2fe   : > { %v1181_v55 = vpop.permute.xlu2 %1180 }
 0x306   : > { %v1172_v47 = vpop.permute.xlu2 %1171 }
 0x30e   : > { %v1146_v5 = vpop.permute.xlu2 %1145 }
 0x316   : > { %v1192_v57 = vpop.permute.xlu0 %1191  ;;  %v1138_v18 = vpop.permute.xlu2 %1137 }
 0x317   : > { %v1194_v58 = vpop.permute.xlu1 %1193 }
 0x318   : > { %v1195_v42 = vsel %vm946_vm3, %v1192_v57, %v1194_v58  ;;  %v1199_v45 = vsel %vm946_vm3, %v1194_v58, %v1192_v57  ;;  %v1450_v57 = vld [vmem:[#allocation4 + $0x2e0] sm:$0xff] }
 0x319   : > { %v1200_v44 = vmul.f32 %v1195_v42, %v953_v35  ;;  %v1201_v46 = vmul.f32 %v1199_v45, %v954_v36  ;;  %v1482_v45 = vld [vmem:[#allocation4 + $0x3e0] sm:$0xff] }
 0x31b   : > { %1219 = vmatpush.msrb.mxu0 %v1200_v44  ;;  %1239 = vmatpush.msrb.mxu1 %v1201_v46  ;;  %v1382_v44 = vld [vmem:[#allocation4 + $0xc0] sm:$0xff] }
 0x31c   : > { %v1414_v46 = vld [vmem:[#allocation4 + $0x1c0] sm:$0xff] }
 0x31e   : > { %v1183_v50 = vpop.permute.xlu0 %1182  ;;  %v1112_v9 = vpop.permute.xlu2 %1111 }
 0x31f   : > { %v1170_v51 = vpop.permute.xlu1 %1169  ;;  %v1184_v52 = vsel %vm929_vm2, %v1181_v55, %v1183_v50  ;;  %v1188_v53 = vsel %vm929_vm2, %v1183_v50, %v1181_v55  ;;  %vm2491_vm2 = vcmask 588800   ;;  %v1416_v55 = vld [vmem:[#allocation4 + $0x1d0] sm:$0xff] }
 0x320   : > { %v1173_v2 = vsel %vm912_vm4, %v1170_v51, %v1172_v47  ;;  %v1177_v3 = vsel %vm912_vm4, %v1172_v47, %v1170_v51  ;;  %v1189_v4 = vmul.f32 %v1184_v52, %v936_v40  ;;  %v1190_v33 = vmul.f32 %v1188_v53, %v937_v41  ;;  %vm2492_vm3 = vmmov %vm2491_vm2  ;;  %1508 = vmatpush.msrb.mxu3 %v1416_v55  ;;  %v1448_v51 = vld [vmem:[#allocation4 + $0x2d0] sm:$0xff] }
 0x321   : > { %v1178_v35 = vmul.f32 %v1173_v2, %v919_v48  ;;  %v1179_v36 = vmul.f32 %v1177_v3, %v920_v49  ;;  %v1156_v49 = vmul.f32 %v1108_v32, %v885_v0  ;;  %v1480_v52 = vld [vmem:[#allocation4 + $0x3d0] sm:$0xff] }
 0x322   : > { %1220 = vmatpush.msrb.mxu0 %v1189_v4  ;;  %1240 = vmatpush.msrb.mxu1 %v1190_v33  ;;  %v1380_v53 = vld [vmem:[#allocation4 + $0xb0] sm:$0xff]  ;;  %v1446_v33 = vld [vmem:[#allocation4 + $0x2c0] sm:$0xff] }
 0x323   : > { %1509 = vmatpush.msrb.mxu3 %v1414_v46  ;;  %v1412_v4 = vld [vmem:[#allocation4 + $0x1b0] sm:$0xff]  ;;  %v1394_v46 = vld [vmem:[#allocation4 + $0x120] sm:$0xff] }
 0x324   : > { %1221 = vmatpush.msrb.mxu0 %v1178_v35  ;;  %1241 = vmatpush.msrb.mxu1 %v1179_v36  ;;  %v1478_v35 = vld [vmem:[#allocation4 + $0x3c0] sm:$0xff] }
 0x325   : > { %1510 = vmatpush.msrb.mxu3 %v1412_v4  ;;  %v1378_v36 = vld [vmem:[#allocation4 + $0xa0] sm:$0xff] }
 0x326   : > { %v1159_v40 = vpop.permute.xlu0 %1158 }
 0x327   : > { %v1161_v7 = vpop.permute.xlu1 %1160  ;;  %1511 = vmatpush.msrb.mxu3 %v1410_v10  ;;  %v1426_v10 = vld [vmem:[#allocation4 + $0x220] sm:$0xff] }
 0x328   : > { %v1162_v34 = vsel %vm895_vm5, %v1159_v40, %v1161_v7  ;;  %v1166_v41 = vsel %vm895_vm5, %v1161_v7, %v1159_v40  ;;  %v1444_v7 = vld [vmem:[#allocation4 + $0x2b0] sm:$0xff] }
 0x329   : > { %v1167_v39 = vmul.f32 %v1162_v34, %v902_v60  ;;  %v1168_v48 = vmul.f32 %v1166_v41, %v903_v61  ;;  %v1476_v34 = vld [vmem:[#allocation4 + $0x3b0] sm:$0xff] }
 0x32a   : > { %v1376_v41 = vld [vmem:[#allocation4 + $0x90] sm:$0xff] }
 0x32b   : > { %1222 = vmatpush.msrb.mxu0 %v1167_v39  ;;  %1242 = vmatpush.msrb.mxu1 %v1168_v48  ;;  %v1408_v39 = vld [vmem:[#allocation4 + $0x190] sm:$0xff]  ;;  %v1442_v48 = vld [vmem:[#allocation4 + $0x2a0] sm:$0xff] }
 0x32c   : > { %1512 = vmatpush.msrb.mxu3 %v1408_v39  ;;  %v1358_v39 = vld [vmem:[#allocation4] sm:$0xff] }
 0x32d   : > { %1223 = vmatpush.msrb.mxu0 %v1156_v49  ;;  %1243 = vmatpush.msrb.mxu1 %v1157_v16  ;;  %v1474_v49 = vld [vmem:[#allocation4 + $0x3a0] sm:$0xff] }
 0x32e   : > { %v1149_v17 = vpop.permute.xlu0 %1148  ;;  %v1374_v16 = vld [vmem:[#allocation4 + $0x80] sm:$0xff] }
 0x32f   : > { %v1135_v19 = vpop.permute.xlu1 %1134  ;;  %v1150_v8 = vsel %vm872_vm7, %v1149_v17, %v1146_v5  ;;  %v1153_v60 = vsel %vm872_vm7, %v1146_v5, %v1149_v17  ;;  %v1406_v17 = vld [vmem:[#allocation4 + $0x180] sm:$0xff] }
 0x330   : > { %v1139_v56 = vsel %vm855_vm6, %v1138_v18, %v1135_v19  ;;  %v1142_v61 = vsel %vm855_vm6, %v1135_v19, %v1138_v18  ;;  %v1154_v20 = vmul.f32 %v1153_v60, %v878_v11  ;;  %v1155_v59 = vmul.f32 %v1150_v8, %v879_v12  ;;  %v1440_v18 = vld [vmem:[#allocation4 + $0x290] sm:$0xff]  ;;  %1513 = vmatpush.msrb.mxu3 %v1406_v17 }
 0x331   : > { %v1143_v0 = vmul.f32 %v1142_v61, %v861_v14  ;;  %v1144_v1 = vmul.f32 %v1139_v56, %v862_v15  ;;  %v1472_v19 = vld [vmem:[#allocation4 + $0x390] sm:$0xff]  ;;  %v1438_v56 = vld [vmem:[#allocation4 + $0x280] sm:$0xff] }
 0x332   : > { %1224 = vmatpush.msrb.mxu0 %v1154_v20  ;;  %1244 = vmatpush.msrb.mxu1 %v1155_v59  ;;  %v1372_v8 = vld [vmem:[#allocation4 + $0x70] sm:$0xff]  ;;  %v1470_v61 = vld [vmem:[#allocation4 + $0x380] sm:$0xff] }
 0x333   : > { %v1404_v60 = vld [vmem:[#allocation4 + $0x170] sm:$0xff]  ;;  %v1370_v20 = vld [vmem:[#allocation4 + $0x60] sm:$0xff] }
 0x334   : > { %1225 = vmatpush.msrb.mxu0 %v1143_v0  ;;  %1245 = vmatpush.msrb.mxu1 %v1144_v1  ;;  %v1402_v59 = vld [vmem:[#allocation4 + $0x160] sm:$0xff]  ;;  %v1436_v0 = vld [vmem:[#allocation4 + $0x270] sm:$0xff] }
 0x335   : > { %1514 = vmatpush.msrb.mxu3 %v1404_v60  ;;  %v1456_v17 = vld [vmem:[#allocation4 + $0x310] sm:$0xff]  ;;  %v1422_v60 = vld [vmem:[#allocation4 + $0x200] sm:$0xff] }
 0x336   : > { %v1124_v21 = vpop.permute.xlu0 %1123 }
 0x337   : > { %v1127_v24 = vpop.permute.xlu1 %1126  ;;  %1515 = vmatpush.msrb.mxu3 %v1402_v59  ;;  %v1419_v59 = vld [vmem:[#allocation4 + $0x1e8] sm:$0xff] }
 0x338   : > { %v1128_v25 = vsel %vm838_vm8, %v1127_v24, %v1124_v21  ;;  %v1131_v26 = vsel %vm838_vm8, %v1124_v21, %v1127_v24  ;;  %v1468_v21 = vld [vmem:[#allocation4 + $0x370] sm:$0xff] }
 0x339   : > { %v1132_v6 = vmul.f32 %v1131_v26, %v844_v22  ;;  %v1133_v11 = vmul.f32 %v1128_v25, %v845_v23  ;;  %v1202_v22 = vld [vmem:[%s2481_s7] sm:$0xff]  ;;  %v1388_v23 = vld [vmem:[#allocation4 + $0xf0] sm:$0xff] }
 0x33a   : > { %1486 = vmatpush.msrb.mxu2 %v1388_v23  ;;  %v1368_v26 = vld [vmem:[#allocation4 + $0x50] sm:$0xff] }
 0x33b   : > { %1226 = vmatpush.msrb.mxu0 %v1132_v6  ;;  %1246 = vmatpush.msrb.mxu1 %v1133_v11  ;;  %v1400_v6 = vld [vmem:[#allocation4 + $0x150] sm:$0xff]  ;;  %v1434_v11 = vld [vmem:[#allocation4 + $0x260] sm:$0xff] }
 0x33c   : > { %1487 = vmatpush.msrb.mxu2 %v1386_v30  ;;  %1516 = vmatpush.msrb.mxu3 %v1400_v6  ;;  %v1464_v23 = vld [vmem:[#allocation4 + $0x350] sm:$0xff] }
 0x33d   : > { %v1364_v30 = vld [vmem:[#allocation4 + $0x30] sm:$0xff] }
 0x33e   : > { %v1116_v12 = vpop.permute.xlu0 %1115  ;;  %1488 = vmatpush.msrb.mxu2 %v1384_v54 }
 0x33f   : > { %v1117_v14 = vsel %vm821_vm9, %v1116_v12, %v1112_v9  ;;  %v1120_v15 = vsel %vm821_vm9, %v1112_v9, %v1116_v12  ;;  %v1207_v13 = vpop.permute.xlu1 %1206  ;;  %v1466_v12 = vld [vmem:[#allocation4 + $0x360] sm:$0xff] }
 0x340   : > { %v1121_v62 = vmul.f32 %v1120_v15, %v827_v37  ;;  %v1122_v63 = vmul.f32 %v1117_v14, %v828_v38  ;;  %v1452_v38 = vld [vmem:[#allocation4 + $0x2f0] sm:$0xff]  ;;  %1489 = vmatpush.msrb.mxu2 %v1382_v44  ;;  %v1366_v15 = vld [vmem:[#allocation4 + $0x40] sm:$0xff] }
 0x341   : > { %v1362_v44 = vld [vmem:[#allocation4 + $0x20] sm:$0xff] }
 0x342   : > { %1227 = vmatpush.msrb.mxu0 %v1121_v62  ;;  %1247 = vmatpush.msrb.mxu1 %v1122_v63  ;;  %v1398_v62 = vld [vmem:[#allocation4 + $0x140] sm:$0xff] }
 0x343   : > { %1806 = vmatmul.msk.f32.vlgmr.msrb.gmra.mxu0 %vm2491_vm2, %v1202_v22  ;;  %1807 = vmatmul.msk.f32.vlgmr.msrb.gmra.mxu1 %vm2492_vm3, %v1202_v22  ;;  %vm2501_vm2 = vmmov %vm2499_vm0 }
 0x344   : > { %1526 = vmatpush.msra.mxu0 %v1452_v38  ;;  %1546 = vmatpush.msra.mxu1 %v1484_v43  ;;  %v1430_v38 = vld [vmem:[#allocation4 + $0x240] sm:$0xff]  ;;  %v1411_v43 = vld [vmem:[#allocation4 + $0x1a8] sm:$0xff] }
 0x345   : > { %1490 = vmatpush.msrb.mxu2 %v1380_v53  ;;  %1517 = vmatpush.msrb.mxu3 %v1398_v62 }
 0x346   : > { %1527 = vmatpush.msra.mxu0 %v1450_v57  ;;  %1547 = vmatpush.msra.mxu1 %v1482_v45  ;;  %v1462_v57 = vld [vmem:[#allocation4 + $0x340] sm:$0xff] }
 0x347   : > { %1491 = vmatpush.msrb.mxu2 %v1378_v36  ;;  %1518 = vmatpush.msrb.mxu3 %v1396_v28  ;;  %v1392_v36 = vld [vmem:[#allocation4 + $0x110] sm:$0xff] }
 0x348   : > { %1528 = vmatpush.msra.mxu0 %v1448_v51  ;;  %1548 = vmatpush.msra.mxu1 %v1480_v52  ;;  %v1428_v51 = vld [vmem:[#allocation4 + $0x230] sm:$0xff] }
 0x349   : > { %1492 = vmatpush.msrb.mxu2 %v1376_v41  ;;  %1519 = vmatpush.msrb.mxu3 %v1394_v46  ;;  %v1409_v46 = vld [vmem:[#allocation4 + $0x198] sm:$0xff] }
 0x34a   : > { %1529 = vmatpush.msra.mxu0 %v1446_v33  ;;  %1549 = vmatpush.msra.mxu1 %v1478_v35  ;;  %v1360_v35 = vld [vmem:[#allocation4 + $0x10] sm:$0xff] }
 0x34b   : > { %1493 = vmatpush.msrb.mxu2 %v1374_v16  ;;  %1520 = vmatpush.msrb.mxu3 %v1392_v36  ;;  %v1473_v36 = vld [vmem:[#allocation4 + $0x398] sm:$0xff] }
 0x34c   : > { %1530 = vmatpush.msra.mxu0 %v1444_v7  ;;  %1550 = vmatpush.msra.mxu1 %v1476_v34  ;;  %v1458_v7 = vld [vmem:[#allocation4 + $0x320] sm:$0xff] }
 0x34d   : > { %1494 = vmatpush.msrb.mxu2 %v1372_v8 }
 0x34e   : > { %1531 = vmatpush.msra.mxu0 %v1442_v48  ;;  %1551 = vmatpush.msra.mxu1 %v1474_v49  ;;  %v1390_v48 = vld [vmem:[#allocation4 + $0x100] sm:$0xff]  ;;  %v1424_v49 = vld [vmem:[#allocation4 + $0x210] sm:$0xff] }
 0x34f   : > { %1495 = vmatpush.msrb.mxu2 %v1370_v20  ;;  %1521 = vmatpush.msrb.mxu3 %v1390_v48  ;;  %v1387_v20 = vld [vmem:[#allocation4 + $0xe8] sm:$0xff] }
 0x350   : > { %1532 = vmatpush.msra.mxu0 %v1440_v18  ;;  %1552 = vmatpush.msra.mxu1 %v1472_v19  ;;  %v1389_v18 = vld [vmem:[#allocation4 + $0xf8] sm:$0xff]  ;;  %v1471_v48 = vld [vmem:[#allocation4 + $0x388] sm:$0xff] }
 0x351   : > { %1496 = vmatpush.msrb.mxu2 %v1368_v26  ;;  %v1421_v19 = vld [vmem:[#allocation4 + $0x1f8] sm:$0xff] }
 0x352   : > { %1533 = vmatpush.msra.mxu0 %v1438_v56  ;;  %1553 = vmatpush.msra.mxu1 %v1470_v61  ;;  %v1454_v56 = vld [vmem:[#allocation4 + $0x300] sm:$0xff]  ;;  %v1417_v26 = vld [vmem:[#allocation4 + $0x1d8] sm:$0xff] }
 0x353   : > { %1497 = vmatpush.msrb.mxu2 %v1366_v15  ;;  %1586 = vmatpush.msra.mxu3 %v1421_v19  ;;  %v1415_v15 = vld [vmem:[#allocation4 + $0x1c8] sm:$0xff]  ;;  %v1437_v19 = vld [vmem:[#allocation4 + $0x278] sm:$0xff] }
 0x354   : > { %1534 = vmatpush.msra.mxu0 %v1436_v0  ;;  %1554 = vmatpush.msra.mxu1 %v1468_v21  ;;  %v1485_v21 = vld [vmem:[#allocation4 + $0x3f8] sm:$0xff] }
 0x355   : > { %1498 = vmatpush.msrb.mxu2 %v1364_v30  ;;  %1587 = vmatpush.msra.mxu3 %v1419_v59  ;;  %v1479_v30 = vld [vmem:[#allocation4 + $0x3c8] sm:$0xff] }
 0x356   : > { %1535 = vmatpush.msra.mxu0 %v1434_v11  ;;  %1555 = vmatpush.msra.mxu1 %v1466_v12  ;;  %v1451_v11 = vld [vmem:[#allocation4 + $0x2e8] sm:$0xff] }
 0x357   : > { %1499 = vmatpush.msrb.mxu2 %v1362_v44  ;;  %1588 = vmatpush.msra.mxu3 %v1417_v26  ;;  %v1377_v44 = vld [vmem:[#allocation4 + $0x98] sm:$0xff]  ;;  %v1435_v59 = vld [vmem:[#allocation4 + $0x268] sm:$0xff] }
 0x358   : > { %1556 = vmatpush.msra.mxu1 %v1464_v23  ;;  %v1381_v23 = vld [vmem:[#allocation4 + $0xb8] sm:$0xff] }
 0x359   : > { %1500 = vmatpush.msrb.mxu2 %v1360_v35  ;;  %1589 = vmatpush.msra.mxu3 %v1415_v15  ;;  %v1441_v35 = vld [vmem:[#allocation4 + $0x298] sm:$0xff]  ;;  %v1431_v15 = vld [vmem:[#allocation4 + $0x248] sm:$0xff] }
 0x35a   : > { %1557 = vmatpush.msra.mxu1 %v1462_v57  ;;  %v1477_v57 = vld [vmem:[#allocation4 + $0x3b8] sm:$0xff] }
 0x35b   : > { %1501 = vmatpush.msrb.mxu2 %v1358_v39  ;;  %v1439_v39 = vld [vmem:[#allocation4 + $0x288] sm:$0xff]  ;;  %v1433_v26 = vld [vmem:[#allocation4 + $0x258] sm:$0xff] }
 0x35d   : > { %1566 = vmatpush.msra.mxu2 %v1389_v18 }
 0x35f   : > { %1567 = vmatpush.msra.mxu2 %v1387_v20 }
 0x3c0   : > { %v1229_v29 = vpop.f32.mrf.mxu0  ;;  %v1249_v37 = vpop.f32.mrf.mxu1 }
 0x3c1   : > { %v2362_v31 = vadd.f32 %v1229_v29, %v1207_v13  ;;  %v2364_v32 = vadd.f32 %v1249_v37, %v1207_v13  ;;  %v1432_v13 = vld [vmem:[#allocation4 + $0x250] sm:$0xff] }
 0x3c2   : > { %1536 = vmatpush.msra.mxu0 %v1432_v13 }
 0x3c3   : > { %v2367_v58 = vmul.f32 0.70710677, %v2362_v31  ;;  %v2370_v42 = vmul.f32 0.70710677, %v2364_v32 }
 0x3c4   : > { %1537 = vmatpush.msra.mxu0 %v1430_v38  ;;  %v1379_v38 = vld [vmem:[#allocation4 + $0xa8] sm:$0xff] }
 0x3c5   : > { %v2373_v47 = vand.u32 2147483647, %v2367_v58  ;;  %v2376_v50 = vand.u32 2147483647, %v2370_v42  ;;  %vm1340_vm12 = vcmp.ge.f32.partialorder %v2367_v58, 0.0  ;;  %vm1341_vm13 = vcmp.ge.f32.partialorder %v2370_v42, 0.0 }
 0x3c6   : > { %1538 = vmatpush.msra.mxu0 %v1428_v51 }
 0x3c7   : > { %v1258_v2 = vmul.f32 0.5, %v2373_v47  ;;  %v1259_v3 = vmul.f32 0.5, %v2376_v50 }
 0x3c8   : > { %1539 = vmatpush.msra.mxu0 %v1426_v10 }
 0x3c9   : > { %v2380_v5 = vadd.f32 1.0, %v1258_v2  ;;  %v2382_v40 = vadd.f32 1.0, %v1259_v3  ;;  %v1460_v3 = vld [vmem:[#allocation4 + $0x330] sm:$0xff] }
 0x3ca   : > { %1558 = vmatpush.msra.mxu1 %v1460_v3  ;;  %1540 = vmatpush.msra.mxu0 %v1424_v49  ;;  %v1375_v3 = vld [vmem:[#allocation4 + $0x88] sm:$0xff] }
 0x3cb   : > { %1871 = vrcp.f32 %v2380_v5  ;;  %vm1267_vm5 = vweird.f32 %v2380_v5  ;;  %v1273_v63 = vand.u32 2147483648, %v2380_v5  ;;  %v1271_v29 = vand.u32 2147483647, %v2380_v5 }
 0x3cc   : > { %1873 = vrcp.f32 %v2382_v40  ;;  %v1288_v37 = vand.u32 2147483648, %v2382_v40  ;;  %v1286_v55 = vand.u32 2147483647, %v2382_v40  ;;  %vm1282_vm8 = vweird.f32 %v2382_v40  ;;  %1559 = vmatpush.msra.mxu1 %v1458_v7  ;;  %1541 = vmatpush.msra.mxu0 %v1422_v60  ;;  %v1405_v7 = vld [vmem:[#allocation4 + $0x178] sm:$0xff] }
 0x3cd   : > { %v1274_v52 = vor.u32 1.1754944e-38, %v1273_v63  ;;  %vm1272_vm10 = vcmp.eq.f32.partialorder %v1271_v29, 8.507059e+37  ;;  %v1449_v63 = vld [vmem:[#allocation4 + $0x2d8] sm:$0xff] }
 0x3ce   : > { %v1289_v33 = vor.u32 1.1754944e-38, %v1288_v37  ;;  %vm1287_vm11 = vcmp.eq.f32.partialorder %v1286_v55, 8.507059e+37  ;;  %1560 = vmatpush.msra.mxu1 %v1456_v17  ;;  %v1447_v37 = vld [vmem:[#allocation4 + $0x2c8] sm:$0xff]  ;;  %v1445_v55 = vld [vmem:[#allocation4 + $0x2b8] sm:$0xff] }
 0x3cf   : > { %v1403_v17 = vld [vmem:[#allocation4 + $0x168] sm:$0xff] }
 0x3d0   : > { %1561 = vmatpush.msra.mxu1 %v1454_v56  ;;  %v1369_v56 = vld [vmem:[#allocation4 + $0x58] sm:$0xff] }
 0x3d1   : > { %v2386_v1 = vpop.eup %1871 }
 0x3d2   : > { %v2388_v24 = vpop.eup %1873  ;;  %v1263_v25 = vmul.f32 %v2386_v1, %v2380_v5  ;;  %vm1268_vm4 = vweird.f32 %v2386_v1  ;;  %1626 = vmatpush.msrb.mxu1 %v1485_v21  ;;  %v1367_v21 = vld [vmem:[#allocation4 + $0x48] sm:$0xff] }
 0x3d3   : > { %v1278_v9 = vmul.f32 %v2388_v24, %v2382_v40  ;;  %vm1283_vm6 = vweird.f32 %v2388_v24  ;;  %vm2405_vm7 = vmor %vm1267_vm5, %vm1268_vm4 }
 0x3d4   : > { %v1264_v14 = vsub.f32 1.0, %v1263_v25  ;;  %vm2416_vm9 = vmor %vm1282_vm8, %vm1283_vm6  ;;  %v1385_v25 = vld [vmem:[#allocation4 + $0xd8] sm:$0xff] }
 0x3d5   : > { %v1279_v22 = vsub.f32 1.0, %v1278_v9  ;;  %v1483_v9 = vld [vmem:[#allocation4 + $0x3e8] sm:$0xff]  ;;  %1568 = vmatpush.msra.mxu2 %v1385_v25 }
 0x3d6   : > { %v1265_v27 = vmul.f32 %v2386_v1, %v1264_v14  ;;  %v1383_v14 = vld [vmem:[#allocation4 + $0xc8] sm:$0xff]  ;;  %1627 = vmatpush.msrb.mxu1 %v1483_v9  ;;  %v1365_v9 = vld [vmem:[#allocation4 + $0x38] sm:$0xff] }
 0x3d7   : > { %v1280_v54 = vmul.f32 %v2388_v24, %v1279_v22  ;;  %v1481_v22 = vld [vmem:[#allocation4 + $0x3d8] sm:$0xff]  ;;  %1569 = vmatpush.msra.mxu2 %v1383_v14 }
 0x3d8   : > { %v1266_v45 = vadd.f32 %v2386_v1, %v1265_v27  ;;  %v1413_v27 = vld [vmem:[#allocation4 + $0x1b8] sm:$0xff]  ;;  %1628 = vmatpush.msrb.mxu1 %v1481_v22  ;;  %v1363_v22 = vld [vmem:[#allocation4 + $0x28] sm:$0xff] }
 0x3d9   : > { %v1281_v53 = vadd.f32 %v2388_v24, %v1280_v54  ;;  %1570 = vmatpush.msra.mxu2 %v1381_v23  ;;  %1590 = vmatpush.msra.mxu3 %v1413_v27  ;;  %v1429_v27 = vld [vmem:[#allocation4 + $0x238] sm:$0xff] }
 0x3da   : > { %v1270_v4 = vsel %vm2405_vm7, %v2386_v1, %v1266_v45  ;;  %v1453_v1 = vld [vmem:[#allocation4 + $0x2f8] sm:$0xff]  ;;  %1629 = vmatpush.msrb.mxu1 %v1479_v30 }
 0x3db   : > { %v2423_v5 = vsel %vm1272_vm10, %v1274_v52, %v1270_v4  ;;  %v1285_v40 = vsel %vm2416_vm9, %v2388_v24, %v1281_v53  ;;  %1606 = vmatpush.msrb.mxu0 %v1453_v1  ;;  %1571 = vmatpush.msra.mxu2 %v1379_v38  ;;  %v1443_v52 = vld [vmem:[#allocation4 + $0x2a8] sm:$0xff]  ;;  %v1361_v30 = vld [vmem:[#allocation4 + $0x18] sm:$0xff] }
 0x3dc   : > { %v1292_v34 = vmul.f32 0.17087276, %v2423_v5  ;;  %v2429_v41 = vsel %vm1287_vm11, %v1289_v33, %v1285_v40  ;;  %1591 = vmatpush.msra.mxu3 %v1411_v43  ;;  %v1475_v53 = vld [vmem:[#allocation4 + $0x3a8] sm:$0xff]  ;;  %1630 = vmatpush.msrb.mxu1 %v1477_v57  ;;  %v1373_v40 = vld [vmem:[#allocation4 + $0x78] sm:$0xff]  ;;  %v1328_v43 = vsub.f32 0.0, %v2373_v47 }
 0x3dd   : > { %v1293_v16 = vmul.f32 0.17087276, %v2429_v41  ;;  %1607 = vmatpush.msrb.mxu0 %v1451_v11  ;;  %v1407_v4 = vld [vmem:[#allocation4 + $0x188] sm:$0xff]  ;;  %1572 = vmatpush.msra.mxu2 %v1377_v44 }
 0x3de   : > { %v1294_v8 = vadd.f32 -0.82215226, %v1292_v34  ;;  %1592 = vmatpush.msra.mxu3 %v1409_v46  ;;  %1631 = vmatpush.msrb.mxu1 %v1475_v53  ;;  %v1359_v44 = vld [vmem:[#allocation4 + $0x8] sm:$0xff]  ;;  %v1457_v53 = vld [vmem:[#allocation4 + $0x318] sm:$0xff] }
 0x3df   : > { %v1295_v61 = vadd.f32 -0.82215226, %v1293_v16  ;;  %1608 = vmatpush.msrb.mxu0 %v1449_v63  ;;  %1573 = vmatpush.msra.mxu2 %v1375_v3  ;;  %v1371_v16 = vld [vmem:[#allocation4 + $0x68] sm:$0xff] }
 0x3e0   : > { %v1296_v0 = vmul.f32 %v1294_v8, %v2423_v5  ;;  %1593 = vmatpush.msra.mxu3 %v1407_v4  ;;  %1632 = vmatpush.msrb.mxu1 %v1473_v36  ;;  %v1469_v8 = vld [vmem:[#allocation4 + $0x378] sm:$0xff]  ;;  %v1391_v46 = vld [vmem:[#allocation4 + $0x108] sm:$0xff]  ;;  %v1330_v4 = vmul.f32 %v1328_v43, %v2373_v47 }
 0x3e1   : > { %v1297_v24 = vmul.f32 %v1295_v61, %v2429_v41  ;;  %1609 = vmatpush.msrb.mxu0 %v1447_v37  ;;  %1574 = vmatpush.msra.mxu2 %v1373_v40  ;;  %v1401_v61 = vld [vmem:[#allocation4 + $0x158] sm:$0xff] }
 0x3e2   : > { %v1298_v6 = vadd.f32 1.4885159, %v1296_v0  ;;  %1594 = vmatpush.msra.mxu3 %v1405_v7  ;;  %1633 = vmatpush.msrb.mxu1 %v1471_v48  ;;  %v1467_v0 = vld [vmem:[#allocation4 + $0x368] sm:$0xff] }
 0x3e3   : > { %v1299_v12 = vadd.f32 1.4885159, %v1297_v24  ;;  %1610 = vmatpush.msrb.mxu0 %v1445_v55  ;;  %1575 = vmatpush.msra.mxu2 %v1371_v16  ;;  %v1399_v24 = vld [vmem:[#allocation4 + $0x148] sm:$0xff] }
 0x3e4   : > { %v1300_v62 = vmul.f32 %v1298_v6, %v2423_v5  ;;  %1595 = vmatpush.msra.mxu3 %v1403_v17  ;;  %1634 = vmatpush.msrb.mxu1 %v1469_v8  ;;  %v1465_v6 = vld [vmem:[#allocation4 + $0x358] sm:$0xff]  ;;  %v1459_v55 = vld [vmem:[#allocation4 + $0x328] sm:$0xff] }
 0x3e5   : > { %v1301_v13 = vmul.f32 %v1299_v12, %v2429_v41  ;;  %1611 = vmatpush.msrb.mxu0 %v1443_v52  ;;  %1576 = vmatpush.msra.mxu2 %v1369_v56  ;;  %v1397_v12 = vld [vmem:[#allocation4 + $0x138] sm:$0xff] }
 0x3e6   : > { %v1302_v29 = vadd.f32 -1.135204, %v1300_v62  ;;  %1596 = vmatpush.msra.mxu3 %v1401_v61  ;;  %1635 = vmatpush.msrb.mxu1 %v1467_v0  ;;  %v1463_v62 = vld [vmem:[#allocation4 + $0x348] sm:$0xff]  ;;  %v1425_v52 = vld [vmem:[#allocation4 + $0x218] sm:$0xff] }
 0x3e7   : > { %v1303_v28 = vadd.f32 -1.135204, %v1301_v13  ;;  %1612 = vmatpush.msrb.mxu0 %v1441_v35  ;;  %1577 = vmatpush.msra.mxu2 %v1367_v21  ;;  %v1395_v13 = vld [vmem:[#allocation4 + $0x128] sm:$0xff] }
 0x3e8   : > { %v1304_v54 = vmul.f32 %v1302_v29, %v2423_v5  ;;  %1597 = vmatpush.msra.mxu3 %v1399_v24  ;;  %1636 = vmatpush.msrb.mxu1 %v1465_v6  ;;  %v1461_v29 = vld [vmem:[#allocation4 + $0x338] sm:$0xff]  ;;  %v1455_v35 = vld [vmem:[#allocation4 + $0x308] sm:$0xff] }
 0x3e9   : > { %v1305_v45 = vmul.f32 %v1303_v28, %v2429_v41  ;;  %1613 = vmatpush.msrb.mxu0 %v1439_v39  ;;  %1578 = vmatpush.msra.mxu2 %v1365_v9  ;;  %v1393_v28 = vld [vmem:[#allocation4 + $0x118] sm:$0xff] }
 0x3ea   : > { %v1306_v51 = vadd.f32 0.27886808, %v1304_v54  ;;  %1598 = vmatpush.msra.mxu3 %v1397_v12  ;;  %1637 = vmatpush.msrb.mxu1 %v1463_v62  ;;  %v1427_v54 = vld [vmem:[#allocation4 + $0x228] sm:$0xff] }
 0x3eb   : > { %v1307_v2 = vadd.f32 0.27886808, %v1305_v45  ;;  %1614 = vmatpush.msrb.mxu0 %v1437_v19  ;;  %1579 = vmatpush.msra.mxu2 %v1363_v22  ;;  %v1329_v45 = vsub.f32 0.0, %v2376_v50 }
 0x3ec   : > { %v1308_v33 = vmul.f32 %v1306_v51, %v2423_v5  ;;  %1599 = vmatpush.msra.mxu3 %v1395_v13  ;;  %1638 = vmatpush.msrb.mxu1 %v1461_v29 }
 0x3ed   : > { %v1309_v10 = vmul.f32 %v1307_v2, %v2429_v41  ;;  %1615 = vmatpush.msrb.mxu0 %v1435_v59  ;;  %1580 = vmatpush.msra.mxu2 %v1361_v30 }
 0x3ee   : > { %v1310_v34 = vadd.f32 -0.18628806, %v1308_v33  ;;  %1600 = vmatpush.msra.mxu3 %v1393_v28  ;;  %1639 = vmatpush.msrb.mxu1 %v1459_v55  ;;  %v1423_v33 = vld [vmem:[#allocation4 + $0x208] sm:$0xff] }
 0x3ef   : > { %v1311_v49 = vadd.f32 -0.18628806, %v1309_v10  ;;  %1616 = vmatpush.msrb.mxu0 %v1433_v26  ;;  %1581 = vmatpush.msra.mxu2 %v1359_v44  ;;  %v1331_v10 = vmul.f32 %v1329_v45, %v2376_v50  ;;  %v1646_v26 = vld [vmem:[%s2484_s10] sm:$0xf] }
 0x3f0   : > { %v1312_v18 = vmul.f32 %v1310_v34, %v2423_v5  ;;  %1601 = vmatpush.msra.mxu3 %v1391_v46  ;;  %1640 = vmatpush.msrb.mxu1 %v1457_v53 }
 0x3f1   : > { %v1313_v60 = vmul.f32 %v1311_v49, %v2429_v41  ;;  %1617 = vmatpush.msrb.mxu0 %v1431_v15 }
 0x3f2   : > { %v1314_v20 = vadd.f32 0.09678418, %v1312_v18  ;;  %1641 = vmatpush.msrb.mxu1 %v1455_v35 }
 0x3f3   : > { %v1315_v1 = vadd.f32 0.09678418, %v1313_v60  ;;  %1618 = vmatpush.msrb.mxu0 %v1429_v27  ;;  %v1252_v60 = vmul.f32 0.5, %v2362_v31 }
 0x3f4   : > { %v1316_v25 = vmul.f32 %v1314_v20, %v2423_v5  ;;  %v1253_v20 = vmul.f32 0.5, %v2364_v32 }
 0x3f5   : > { %v1317_v11 = vmul.f32 %v1315_v1, %v2429_v41  ;;  %1619 = vmatpush.msrb.mxu0 %v1427_v54 }
 0x3f6   : > { %v1318_v14 = vadd.f32 0.37409195, %v1316_v25 }
 0x3f7   : > { %v1319_v63 = vadd.f32 0.37409195, %v1317_v11  ;;  %1620 = vmatpush.msrb.mxu0 %v1425_v52 }
 0x3f8   : > { %v1320_v23 = vmul.f32 %v1318_v14, %v2423_v5 }
 0x3f9   : > { %v1321_v37 = vmul.f32 %v1319_v63, %v2429_v41  ;;  %1621 = vmatpush.msrb.mxu0 %v1423_v33  ;;  %v1651_v63 = vpop.permute.xlu2 %1650 }
 0x3fa   : > { %v1322_v38 = vadd.f32 1.0000237, %v1320_v23 }
 0x3fb   : > { %v1323_v57 = vadd.f32 1.0000237, %v1321_v37 }
 0x3fc   : > { %v1324_v51 = vmul.f32 %v1322_v38, %v2423_v5 }
 0x3fd   : > { %v1325_v2 = vmul.f32 %v1323_v57, %v2429_v41 }
 0x3fe   : > { %v1326_v3 = vadd.f32 -1.2655122, %v1324_v51 }
 0x3ff   : > { %v1327_v36 = vadd.f32 -1.2655122, %v1325_v2 }
 0x400   : > { %v1332_v40 = vadd.f32 %v1330_v4, %v1326_v3 }
 0x401   : > { %v1333_v7 = vadd.f32 %v1331_v10, %v1327_v36 }
 0x402   : > { %v1334_v34 = vmul.f32 1.442695, %v1332_v40 }
 0x403   : > { %v1336_v39 = vmul.f32 1.442695, %v1333_v7 }
 0x404   : > { %1875 = vpow2.f32 %v1334_v34 }
 0x405   : > { %1877 = vpow2.f32 %v1336_v39 }
 0x40a   : > { %v1876_v48 = vpop.eup %1875 }
 0x40b   : > { %v1878_v49 = vpop.eup %1877  ;;  %v1338_v47 = vmul.f32 %v1876_v48, %v2423_v5 }
 0x40c   : > { %v1339_v16 = vmul.f32 %v1878_v49, %v2429_v41 }
 0x40d   : > { %v1342_v17 = vsub.f32 1.0, %v1338_v47  ;;  %v1808_v18 = vadd.f32 -1.0, %v1338_v47 }
 0x40e   : > { %v1343_v50 = vsub.f32 1.0, %v1339_v16  ;;  %v1809_v19 = vadd.f32 -1.0, %v1339_v16 }
 0x40f   : > { %v1346_v8 = vsel %vm1340_vm12, %v1342_v17, %v1808_v18 }
 0x410   : > { %v1348_v56 = vadd.f32 1.0, %v1346_v8  ;;  %v1347_v61 = vsel %vm1341_vm13, %v1343_v50, %v1809_v19 }
 0x411   : > { %v1349_v59 = vadd.f32 1.0, %v1347_v61 }
 0x412   : > { %v1350_v0 = vmul.f32 %v1348_v56, %v1252_v60 }
 0x413   : > { %v1351_v5 = vmul.f32 %v1349_v59, %v1253_v20 }
 0x414   : > { %1502 = vmatmul.f32.vlgmr.msrb.gmra.mxu2 %v1350_v0  ;;  %v1354_v41 = vrot.slane %v1350_v0, 4 }
 0x415   : > { %1522 = vmatmul.f32.vlgmr.msrb.gmra.mxu3 %v1351_v5  ;;  %v1355_v1 = vrot.slane %v1351_v5, 4 }
 0x416   : > { %1542 = vmatmul.f32.vlgmr.msra.gmra.mxu0 %v1354_v41 }
 0x417   : > { %1562 = vmatmul.f32.vlgmr.msra.gmra.mxu1 %v1355_v1 }
 0x41c   : > { %1582 = vmatmul.f32.vlgmr.msra.gmra.mxu2 %v1350_v0 }
 0x41d   : > { %1602 = vmatmul.f32.vlgmr.msra.gmra.mxu3 %v1351_v5 }
 0x41e   : > { %1622 = vmatmul.f32.vlgmr.msrb.gmra.mxu0 %v1354_v41 }
 0x41f   : > { %1642 = vmatmul.f32.vlgmr.msrb.gmra.mxu1 %v1355_v1 }
 0x493   : > { %v1543_v42 = vpop.f32.mrf.mxu0 }
 0x494   : > { %v1563_v24 = vpop.f32.mrf.mxu1 }
 0x497   : > { %v1503_v58 = vpop.f32.mrf.mxu2 }
 0x498   : > { %v1523_v31 = vpop.f32.mrf.mxu3 }
 0x499   : > { %v1524_v21 = vadd.f32 %v1523_v31, %v1503_v58 }
 0x49b   : > { %v1544_v25 = vadd.f32 %v1543_v42, %v1524_v21  ;;  %v1623_v12 = vpop.f32.mrf.mxu0 }
 0x49c   : > { %v1643_v15 = vpop.f32.mrf.mxu1 }
 0x49d   : > { %v1564_v32 = vadd.f32 %v1563_v24, %v1544_v25 }
 0x49f   : > { %1810 = vmatpush.msk.msrb.mxu2 %vm2497_vm14, %v1564_v32  ;;  %v1583_v6 = vpop.f32.mrf.mxu2 }
 0x4a0   : > { %v1603_v11 = vpop.f32.mrf.mxu3  ;;  %1811 = vmatmul.msk.f32.vlgmr.msrb.gmra.mxu2 %vm2498_vm15, %v1646_v26 }
 0x4a1   : > { %v1604_v9 = vadd.f32 %v1603_v11, %v1583_v6 }
 0x4a3   : > { %v1624_v14 = vadd.f32 %v1623_v12, %v1604_v9 }
 0x4a5   : > { %v1644_v62 = vadd.f32 %v1643_v15, %v1624_v14 }
 0x4a7   : > { %1812 = vmatpush.msk.msrb.mxu3 %vm2499_vm0, %v1644_v62 }
 0x4a8   : > { %1813 = vmatmul.msk.f32.vlgmr.msrb.gmra.mxu3 %vm2500_vm1, %v1646_v26 }
 0x523   : > { %v1679_v22 = vpop.f32.mrf.mxu2 }
 0x524   : > { %v1680_v27 = vadd.f32 %v1679_v22, %v1651_v63 }
 0x52b   : > { %v1699_v13 = vpop.f32.mrf.mxu3 }
 0x52c   : > { %v1700_v23 = vadd.f32 %v1699_v13, %v1651_v63 }
 0x52e   : > { %v1704_v29 = vrot.slane %v1700_v23, 4 }
 0x530   : > { %v1705_v37 = vsel %vm2501_vm2, %v1680_v27, %v1704_v29 }
 0x531   : > { %1707 = vst [vmem:[%s447_s26] sm:$0xff] %v1705_v37 }
 0x532 PF: > { %s24_s21 = sadd.s32 1, %s1953_s21  }
 0x533   : > { %p21_p7 = scmp.ge.s32.totalorder %s24_s21, 4  }
 0x535   :  { %23 = sbr.rel (!%p21_p7) target bundleno = 2 (0x2), region = 107 }
 0x53a   :  { %1729 = vsyncpa [#allocation3], 1 }
 0x53b   :  { %1731 = vsyncpa [#allocation3 + $0x1], 1 }
 0x53c   :  { %1732 = vsyncpa [#allocation5], 1 }

</bundles_post_ra>
